<compile_context>
chip_gen: v7x
topology: tpu7x:2x2x1
jax: 0.10.0
libtpu: 0.0.40
codegen_flags: <defaults>
</compile_context>

<pallas_src>
import functools

import jax
import jax.numpy as jnp
from jax.experimental import pallas as pl
from jax.experimental.pallas import tpu as pltpu

# ----- module hyperparameters (the **kwargs of Quant_mlp) -----
WBITS = 4          # fc2 / fc3 weight bits (fc1 / fc4 are wbits=32 per __init__)
ABITS = 4          # qact activation bits
WEIGHT_CLIP = 1.0
WEIGHT_SCALE = 1.0
NUM_CLASSES = 10
BN_EPS = 1e-5

IN_FEATURES = 784
HIDDEN = 512
MAX_BATCH_TILE = 128   # rows per grid step once the batch is large enough to matter


def _round_up(x, m):
    return (x + m - 1) // m * m


# ---------------------------------------------------------------------------
# Quantizers (forward semantics only; STE affects backward, not forward).
# ---------------------------------------------------------------------------
def _quantize_weight(w, wbits, clip, scale):
    # TODO(synk): exact QuantLinear quantizer is not given; using standard symmetric
    # uniform weight quantization (clip -> round to 2^(b-1)-1 levels -> scale).
    if wbits >= 32:
        return w * scale
    n = 2.0 ** (wbits - 1) - 1.0
    wc = jnp.clip(w, -clip, clip)
    step = clip / n
    return jnp.round(wc / step) * step * scale


def _act_quant(h, abits):
    # nonlinear(abits): abits==32 -> plain ReLU; otherwise DoReFa-style
    # clamp-to-[0,1] + uniform quantization to 2^abits - 1 levels.
    if abits >= 32:
        return jnp.maximum(h, 0.0)
    levels = 2.0 ** abits - 1.0
    hc = jnp.clip(h, 0.0, 1.0)
    return jnp.round(hc * levels) / levels


# ---------------------------------------------------------------------------
# Pallas kernel: one batch tile of the whole MLP hot path.
# Weights are VMEM-resident across batch tiles (constant index_map).
# ---------------------------------------------------------------------------
def mlp_kernel(x_ref, w1_ref, w2_ref, w3_ref, w4_ref, off_ref, out_ref, *, abits):
    x = x_ref[...]                                             # (TB, 784) bf16

    # fc1 (wbits=32) + bn1 (scale folded into w1) + qact
    h = jnp.dot(x, w1_ref[...], preferred_element_type=jnp.float32) + off_ref[0:1, :]
    h = _act_quant(h, abits)

    # fc2 (quantized weights pre-applied) + bn2 + qact
    h = jnp.dot(h.astype(jnp.bfloat16), w2_ref[...],
                preferred_element_type=jnp.float32) + off_ref[1:2, :]
    h = _act_quant(h, abits)

    # fc3 (quantized weights pre-applied) + bn3 + act (abits=32 -> ReLU)
    h = jnp.dot(h.astype(jnp.bfloat16), w3_ref[...],
                preferred_element_type=jnp.float32) + off_ref[2:3, :]
    h = jnp.maximum(h, 0.0)

    # fc4 (wbits=32, bias folded into offset) + bn4 (scale folded into w4)
    h = jnp.dot(h.astype(jnp.bfloat16), w4_ref[...],
                preferred_element_type=jnp.float32) + off_ref[3:4, :NUM_CLASSES]

    out_ref[...] = h.astype(out_ref.dtype)


def quant_mlp_forward(x, params):
    b = x.shape[0]
    x2 = x.reshape(b, -1).astype(jnp.bfloat16)        # torch.flatten(x, 1); bf16 halves DMA
    k = x2.shape[1]                                    # 784, used unpadded

    # Batch tiling: weights stay VMEM-resident across tiles; batch axis is parallel.
    tb = min(MAX_BATCH_TILE, _round_up(b, 8))
    b_pad = _round_up(b, tb)
    if b_pad != b:
        x2 = jnp.pad(x2, ((0, b_pad - b), (0, 0)))
    grid = (b_pad // tb,)

    w1, w2, w3, w4, off = (params["w1"], params["w2"], params["w3"],
                           params["w4"], params["off"])

    def const_spec(shape):
        return pl.BlockSpec(shape, lambda i: (0, 0))   # same block every step -> no re-DMA

    weight_bytes = sum(int(w.size) * w.dtype.itemsize for w in (w1, w2, w3, w4, off))
    io_bytes = int(x2.size) * x2.dtype.itemsize + b_pad * NUM_CLASSES * 4
    flops = 2 * b_pad * (k * HIDDEN + 2 * HIDDEN * HIDDEN + HIDDEN * NUM_CLASSES)

    out = pl.pallas_call(
        functools.partial(mlp_kernel, abits=ABITS),
        out_shape=jax.ShapeDtypeStruct((b_pad, NUM_CLASSES), jnp.float32),
        grid=grid,
        in_specs=[
            pl.BlockSpec((tb, k), lambda i: (i, 0)),          # x batch tile
            const_spec((k, HIDDEN)),                          # w1 (784, 512)
            const_spec((HIDDEN, HIDDEN)),                     # w2
            const_spec((HIDDEN, HIDDEN)),                     # w3
            const_spec((HIDDEN, NUM_CLASSES)),                # w4 (512, 10) - no zero pad
            const_spec((4, HIDDEN)),                          # packed BN offsets
        ],
        out_specs=pl.BlockSpec((tb, NUM_CLASSES), lambda i: (i, 0)),
        compiler_params=pltpu.CompilerParams(
            dimension_semantics=("parallel",)),
        cost_estimate=pl.CostEstimate(
            flops=flops, transcendentals=0,
            bytes_accessed=weight_bytes + io_bytes),
    )(x2, w1, w2, w3, w4, off)
    return out[:b]


# ---------------------------------------------------------------------------
# Deterministic parameter construction + BN folding (inference-mode BN).
# BN scale is folded into the weight columns; BN offset (and the fc4 bias*scale)
# stays as a per-feature additive vector, packed into a single (4, 512) operand.
# ---------------------------------------------------------------------------
def _bn_scale_offset(key, features):
    kg, kb, km, kv = jax.random.split(key, 4)
    gamma = 1.0 + 0.1 * jax.random.normal(kg, (features,), jnp.float32)
    beta = 0.1 * jax.random.normal(kb, (features,), jnp.float32)
    running_mean = 0.1 * jax.random.normal(km, (features,), jnp.float32)
    running_var = jnp.abs(jax.random.normal(kv, (features,), jnp.float32)) + 0.5
    scale = gamma / jnp.sqrt(running_var + BN_EPS)
    offset = beta - running_mean * scale
    return scale, offset


def make_params(key):
    keys = jax.random.split(key, 9)
    w1 = 0.05 * jax.random.normal(keys[0], (IN_FEATURES, HIDDEN), jnp.float32)
    w2 = 0.05 * jax.random.normal(keys[1], (HIDDEN, HIDDEN), jnp.float32)
    w3 = 0.05 * jax.random.normal(keys[2], (HIDDEN, HIDDEN), jnp.float32)
    w4 = 0.05 * jax.random.normal(keys[3], (HIDDEN, NUM_CLASSES), jnp.float32)
    b4 = 0.05 * jax.random.normal(keys[4], (NUM_CLASSES,), jnp.float32)

    # fc1: wbits=32, fc2/fc3: WBITS, fc4: 32 (per __init__)
    w1q = _quantize_weight(w1, 32, WEIGHT_CLIP, WEIGHT_SCALE)
    w2q = _quantize_weight(w2, WBITS, WEIGHT_CLIP, WEIGHT_SCALE)
    w3q = _quantize_weight(w3, WBITS, WEIGHT_CLIP, WEIGHT_SCALE)
    w4q = _quantize_weight(w4, 32, WEIGHT_CLIP, WEIGHT_SCALE)

    s1, o1 = _bn_scale_offset(keys[5], HIDDEN)
    s2, o2 = _bn_scale_offset(keys[6], HIDDEN)
    s3, o3 = _bn_scale_offset(keys[7], HIDDEN)
    s4, o4 = _bn_scale_offset(keys[8], NUM_CLASSES)

    # Fold BN scales into weight columns:  (x @ W) * s + o  ==  x @ (W * s) + o
    w1f = w1q * s1[None, :]
    w2f = w2q * s2[None, :]
    w3f = w3q * s3[None, :]
    # fc4 has a bias applied before bn4:  ((x @ W) + b) * s + o  ==  x @ (W*s) + (b*s + o)
    w4f = w4q * s4[None, :]
    o4f = o4 + b4 * s4

    # Pack the four additive offsets into one (4, 512) f32 operand (o4 zero-extended).
    off = jnp.zeros((4, HIDDEN), jnp.float32)
    off = off.at[0].set(o1)
    off = off.at[1].set(o2)
    off = off.at[2].set(o3)
    off = off.at[3, :NUM_CLASSES].set(o4f)

    # NOTE: fc1/fc4 are wbits=32 layers in the PyTorch module; streaming them as bf16 is
    # a deliberate precision/DMA trade-off (f32 accumulation on the MXU is kept).
    return dict(
        w1=w1f.astype(jnp.bfloat16),       # (784, 512) - no K padding
        w2=w2f.astype(jnp.bfloat16),
        w3=w3f.astype(jnp.bfloat16),
        w4=w4f.astype(jnp.bfloat16),       # (512, 10)  - no N padding
        off=off,
    )


def reference_forward(x, p):
    """Pure-JAX reference using the exact same (folded, bf16) parameters and op order."""
    b = x.shape[0]
    h = x.reshape(b, -1).astype(jnp.bfloat16)
    h = jnp.dot(h, p["w1"], preferred_element_type=jnp.float32) + p["off"][0:1, :]
    h = _act_quant(h, ABITS)
    h = jnp.dot(h.astype(jnp.bfloat16), p["w2"],
                preferred_element_type=jnp.float32) + p["off"][1:2, :]
    h = _act_quant(h, ABITS)
    h = jnp.dot(h.astype(jnp.bfloat16), p["w3"],
                preferred_element_type=jnp.float32) + p["off"][2:3, :]
    h = jnp.maximum(h, 0.0)
    h = jnp.dot(h.astype(jnp.bfloat16), p["w4"],
                preferred_element_type=jnp.float32) + p["off"][3:4, :NUM_CLASSES]
    return h


if __name__ == "__main__":
    key = jax.random.PRNGKey(0)
    kx, kp = jax.random.split(key)

    # MNIST-like input, NCHW: (batch=8, channels=1, 28, 28) -> flatten -> 784
    x = jax.random.normal(kx, (8, 1, 28, 28), jnp.float32)
    params = make_params(kp)

    out = jax.block_until_ready(quant_mlp_forward(x, params))
    ref = jax.block_until_ready(reference_forward(x, params))

    assert out.shape == (8, NUM_CLASSES), out.shape
    # Loose tolerance: a 1-ulp difference near a 4-bit quantization threshold between the
    # Pallas MXU path and the XLA reference can flip an activation by 1/15 and propagate.
    assert jnp.allclose(out, ref, atol=1e-1, rtol=0.0), "mismatch vs. JAX reference"
    print("KERNEL_OK")
</pallas_src>

<mosaic_0001>
module attributes {stable_mosaic.version = 11 : i64} {
  func.func @mlp_kernel(%arg0: i32, %arg1: memref<8x784xbf16, #tpu.memory_space<vmem>>, %arg2: memref<784x512xbf16, #tpu.memory_space<vmem>>, %arg3: memref<512x512xbf16, #tpu.memory_space<vmem>>, %arg4: memref<512x512xbf16, #tpu.memory_space<vmem>>, %arg5: memref<512x10xbf16, #tpu.memory_space<vmem>>, %arg6: memref<4x512xf32, #tpu.memory_space<vmem>>, %arg7: memref<8x10xf32, #tpu.memory_space<vmem>>) attributes {dimension_semantics = [#tpu.dimension_semantics<parallel>], iteration_bounds = array<i64: 1>, scalar_prefetch = 0 : i64, scratch_operands = 0 : i64, tpu.core_type = #tpu.core_type<tc>, window_params = [{transform_indices = @transform_0, window_bounds = array<i64: 8, 784>}, {pipeline_mode = #tpu.pipeline_mode<synchronous>, transform_indices = @transform_1, window_bounds = array<i64: 784, 512>}, {pipeline_mode = #tpu.pipeline_mode<synchronous>, transform_indices = @transform_2, window_bounds = array<i64: 512, 512>}, {pipeline_mode = #tpu.pipeline_mode<synchronous>, transform_indices = @transform_3, window_bounds = array<i64: 512, 512>}, {pipeline_mode = #tpu.pipeline_mode<synchronous>, transform_indices = @transform_4, window_bounds = array<i64: 512, 10>}, {pipeline_mode = #tpu.pipeline_mode<synchronous>, transform_indices = @transform_5, window_bounds = array<i64: 4, 512>}, {transform_indices = @transform_6, window_bounds = array<i64: 8, 10>}]} {
    %c0 = arith.constant 0 : index
    %c0_0 = arith.constant 0 : index
    %0 = vector.load %arg1[%c0, %c0_0] : memref<8x784xbf16, #tpu.memory_space<vmem>>, vector<8x784xbf16>
    %c0_1 = arith.constant 0 : index
    %c0_2 = arith.constant 0 : index
    %1 = vector.load %arg2[%c0_1, %c0_2] : memref<784x512xbf16, #tpu.memory_space<vmem>>, vector<784x512xbf16>
    %cst = arith.constant dense<0.000000e+00> : vector<8x512xf32>
    %2 = tpu.matmul %0, %1, %cst {dimension_numbers = #tpu.dot_dimension_numbers<[1], [0], [0], [1], [0, 0, 1, 1], [], []>} : vector<8x784xbf16>, vector<784x512xbf16>, vector<8x512xf32> -> vector<8x512xf32>
    %c0_3 = arith.constant 0 : index
    %c0_4 = arith.constant 0 : index
    %3 = vector.load %arg6[%c0_3, %c0_4] : memref<4x512xf32, #tpu.memory_space<vmem>>, vector<1x512xf32>
    %4 = vector.broadcast %3 : vector<1x512xf32> to vector<8x512xf32>
    %5 = arith.addf %2, %4 : vector<8x512xf32>
    %cst_5 = arith.constant 0.000000e+00 : f32
    %cst_6 = arith.constant 1.000000e+00 : f32
    %6 = vector.broadcast %cst_5 : f32 to vector<8x512xf32>
    %7 = arith.maximumf %6, %5 : vector<8x512xf32>
    %8 = vector.broadcast %cst_6 : f32 to vector<8x512xf32>
    %9 = arith.minimumf %8, %7 : vector<8x512xf32>
    %cst_7 = arith.constant 1.500000e+01 : f32
    %10 = vector.broadcast %cst_7 : f32 to vector<8x512xf32>
    %11 = arith.mulf %9, %10 : vector<8x512xf32>
    %12 = math.roundeven %11 : vector<8x512xf32>
    %cst_8 = arith.constant 1.500000e+01 : f32
    %13 = vector.broadcast %cst_8 : f32 to vector<8x512xf32>
    %14 = arith.divf %12, %13 : vector<8x512xf32>
    %15 = arith.truncf %14 : vector<8x512xf32> to vector<8x512xbf16>
    %c0_9 = arith.constant 0 : index
    %c0_10 = arith.constant 0 : index
    %16 = vector.load %arg3[%c0_9, %c0_10] : memref<512x512xbf16, #tpu.memory_space<vmem>>, vector<512x512xbf16>
    %cst_11 = arith.constant dense<0.000000e+00> : vector<8x512xf32>
    %17 = tpu.matmul %15, %16, %cst_11 {dimension_numbers = #tpu.dot_dimension_numbers<[1], [0], [0], [1], [0, 0, 1, 1], [], []>} : vector<8x512xbf16>, vector<512x512xbf16>, vector<8x512xf32> -> vector<8x512xf32>
    %c1 = arith.constant 1 : index
    %c0_12 = arith.constant 0 : index
    %18 = vector.load %arg6[%c1, %c0_12] : memref<4x512xf32, #tpu.memory_space<vmem>>, vector<1x512xf32>
    %19 = vector.broadcast %18 : vector<1x512xf32> to vector<8x512xf32>
    %20 = arith.addf %17, %19 : vector<8x512xf32>
    %cst_13 = arith.constant 0.000000e+00 : f32
    %cst_14 = arith.constant 1.000000e+00 : f32
    %21 = vector.broadcast %cst_13 : f32 to vector<8x512xf32>
    %22 = arith.maximumf %21, %20 : vector<8x512xf32>
    %23 = vector.broadcast %cst_14 : f32 to vector<8x512xf32>
    %24 = arith.minimumf %23, %22 : vector<8x512xf32>
    %cst_15 = arith.constant 1.500000e+01 : f32
    %25 = vector.broadcast %cst_15 : f32 to vector<8x512xf32>
    %26 = arith.mulf %24, %25 : vector<8x512xf32>
    %27 = math.roundeven %26 : vector<8x512xf32>
    %cst_16 = arith.constant 1.500000e+01 : f32
    %28 = vector.broadcast %cst_16 : f32 to vector<8x512xf32>
    %29 = arith.divf %27, %28 : vector<8x512xf32>
    %30 = arith.truncf %29 : vector<8x512xf32> to vector<8x512xbf16>
    %c0_17 = arith.constant 0 : index
    %c0_18 = arith.constant 0 : index
    %31 = vector.load %arg4[%c0_17, %c0_18] : memref<512x512xbf16, #tpu.memory_space<vmem>>, vector<512x512xbf16>
    %cst_19 = arith.constant dense<0.000000e+00> : vector<8x512xf32>
    %32 = tpu.matmul %30, %31, %cst_19 {dimension_numbers = #tpu.dot_dimension_numbers<[1], [0], [0], [1], [0, 0, 1, 1], [], []>} : vector<8x512xbf16>, vector<512x512xbf16>, vector<8x512xf32> -> vector<8x512xf32>
    %c2 = arith.constant 2 : index
    %c0_20 = arith.constant 0 : index
    %33 = vector.load %arg6[%c2, %c0_20] : memref<4x512xf32, #tpu.memory_space<vmem>>, vector<1x512xf32>
    %34 = vector.broadcast %33 : vector<1x512xf32> to vector<8x512xf32>
    %35 = arith.addf %32, %34 : vector<8x512xf32>
    %cst_21 = arith.constant 0.000000e+00 : f32
    %36 = vector.broadcast %cst_21 : f32 to vector<8x512xf32>
    %37 = arith.maximumf %35, %36 : vector<8x512xf32>
    %38 = arith.truncf %37 : vector<8x512xf32> to vector<8x512xbf16>
    %c0_22 = arith.constant 0 : index
    %c0_23 = arith.constant 0 : index
    %39 = vector.load %arg5[%c0_22, %c0_23] : memref<512x10xbf16, #tpu.memory_space<vmem>>, vector<512x10xbf16>
    %cst_24 = arith.constant dense<0.000000e+00> : vector<8x10xf32>
    %40 = tpu.matmul %38, %39, %cst_24 {dimension_numbers = #tpu.dot_dimension_numbers<[1], [0], [0], [1], [0, 0, 1, 1], [], []>} : vector<8x512xbf16>, vector<512x10xbf16>, vector<8x10xf32> -> vector<8x10xf32>
    %c3 = arith.constant 3 : index
    %c0_25 = arith.constant 0 : index
    %41 = vector.load %arg6[%c3, %c0_25] : memref<4x512xf32, #tpu.memory_space<vmem>>, vector<1x10xf32>
    %42 = vector.broadcast %41 : vector<1x10xf32> to vector<8x10xf32>
    %43 = arith.addf %40, %42 : vector<8x10xf32>
    %c0_26 = arith.constant 0 : index
    %c0_27 = arith.constant 0 : index
    %44 = vector.load %arg7[%c0_26, %c0_27] : memref<8x10xf32, #tpu.memory_space<vmem>>, vector<8x10xf32>
    tpu.vector_store %arg7[%c0_26, %c0_27], %43 {strides = array<i32>} : memref<8x10xf32, #tpu.memory_space<vmem>>, vector<8x10xf32>,
    return
  }
  func.func @transform_0(%arg0: i32) -> (i32, i32) {
    %c0_i32 = arith.constant 0 : i32
    %c0_i32_0 = arith.constant 0 : i32
    return %arg0, %c0_i32 : i32, i32
  }
  func.func @transform_1(%arg0: i32) -> (i32, i32) {
    %c0_i32 = arith.constant 0 : i32
    %c0_i32_0 = arith.constant 0 : i32
    %c0_i32_1 = arith.constant 0 : i32
    return %c0_i32, %c0_i32_0 : i32, i32
  }
  func.func @transform_2(%arg0: i32) -> (i32, i32) {
    %c0_i32 = arith.constant 0 : i32
    %c0_i32_0 = arith.constant 0 : i32
    %c0_i32_1 = arith.constant 0 : i32
    return %c0_i32, %c0_i32_0 : i32, i32
  }
  func.func @transform_3(%arg0: i32) -> (i32, i32) {
    %c0_i32 = arith.constant 0 : i32
    %c0_i32_0 = arith.constant 0 : i32
    %c0_i32_1 = arith.constant 0 : i32
    return %c0_i32, %c0_i32_0 : i32, i32
  }
  func.func @transform_4(%arg0: i32) -> (i32, i32) {
    %c0_i32 = arith.constant 0 : i32
    %c0_i32_0 = arith.constant 0 : i32
    %c0_i32_1 = arith.constant 0 : i32
    return %c0_i32, %c0_i32_0 : i32, i32
  }
  func.func @transform_5(%arg0: i32) -> (i32, i32) {
    %c0_i32 = arith.constant 0 : i32
    %c0_i32_0 = arith.constant 0 : i32
    %c0_i32_1 = arith.constant 0 : i32
    return %c0_i32, %c0_i32_0 : i32, i32
  }
  func.func @transform_6(%arg0: i32) -> (i32, i32) {
    %c0_i32 = arith.constant 0 : i32
    %c0_i32_0 = arith.constant 0 : i32
    return %arg0, %c0_i32 : i32, i32
  }
}

</mosaic_0001>

<bundles_post_ra>
// kernel: tpu_custom_call.1
= control target key start
LH: loop header
LB: loop body
LE: loop exit
PB: predicated region body
PF: predicated region fallthrough
CT: control target
= control target key end

     0   :  { %11 = vsyncpa [#allocation3], 0  ;;  %s5650_s0 = inlined_call_operand.vmem [shape: bf16[8,784], index: 0, kind: input, shape index: {}]   ;;  %s5651_s1 = inlined_call_operand.hbm [shape: bf16[784,512], index: 1, kind: input, shape index: {}]   ;;  %s5652_s2 = inlined_call_operand.hbm [shape: bf16[512,512], index: 2, kind: input, shape index: {}]   ;;  %s5653_s3 = inlined_call_operand.hbm [shape: bf16[512,512], index: 3, kind: input, shape index: {}]   ;;  %s5654_s4 = inlined_call_operand.vmem [shape: bf16[512,10], index: 4, kind: input, shape index: {}]   ;;  %s5655_s5 = inlined_call_operand.vmem [shape: f32[4,512], index: 5, kind: input, shape index: {}]   ;;  %s5656_s6 = inlined_call_operand.hbm [shape: f32[8,10], index: 6, kind: output, shape index: {}]  }
   0x1   :  { %12 = vsyncpa [#allocation6], 0 }
   0x2   :  { %13 = vsyncpa [#allocation4], 0  ;;  %s5368_s21 = smov [#allocation5]   ;;  %s5369_s23 = smov [#allocation2]  }
   0x3   :  { %s33_s22 = sshll.u32 %s5368_s21, 4  ;;  %s21_s24 = sshll.u32 %s5369_s23, 4  ;;  %s34_s22 = int_to_ptr.vmem [resolvable:$true] %s33_s22  ;;  %s5410_s24 = int_to_ptr.vmem [resolvable:$true] %s21_s24 }
   0x4   :  { %s5274_s27 = scalar_lea.hbm %s5652_s2, 16384 }
   0x5   :  { %p5275_p0 = scmp.ne.s32.totalorder %s5652_s2, %s5274_s27  ;;  %p5278_p1 = scmp.lt.u32.totalorder %s5274_s27, %s5652_s2 }
   0x7   :  { %p5280_p2 = pnand %p5278_p1, %p5275_p0 }
   0x9   :  { %5283 = shalt.err (!%p5280_p2)
}
   0xa   :  { %s5284_s8 = scalar_lea.vmem %s34_s22, 16384  ;;  %p5289_p4 = scmp.lt.s32.totalorder %s34_s22, %s34_s22 }
   0xb   :  { %p5285_p3 = scmp.ne.s32.totalorder %s34_s22, %s5284_s8  ;;  %p5290_p5 = scmp.lt.s32.totalorder %s5284_s8, %s5284_s8 }
   0xd   :  { %p5291_p6 = por %p5290_p5, %p5289_p4 }
   0xf   :  { %p5292_p7 = pnand %p5291_p6, %p5285_p3 }
  0x11   :  { %5295 = shalt.err (!%p5292_p7)
}
  0x12   :  { %s5370_s9 = smov 256   ;;  %s5371_s10 = smov 16  }
  0x13   :  { %39 = dma.hbm_to_vmem [thread:$0]  %s5652_s2, 16384, %s34_s22, [#allocation6], %s5370_s9, %s5370_s9, %s5371_s10  }
  0x14   :  { %s5296_s15 = scalar_lea.hbm %s5651_s1, 25088 }
  0x15   :  { %p5297_p8 = scmp.ne.s32.totalorder %s5651_s1, %s5296_s15  ;;  %p5300_p9 = scmp.lt.u32.totalorder %s5296_s15, %s5651_s1 }
  0x17   :  { %p5302_p10 = pnand %p5300_p9, %p5297_p8 }
  0x19   :  { %5305 = shalt.err (!%p5302_p10)
}
  0x1a   :  { %s5306_s20 = scalar_lea.vmem %s5410_s24, 25088  ;;  %p5311_p12 = scmp.lt.s32.totalorder %s5410_s24, %s5410_s24 }
  0x1b   :  { %p5307_p11 = scmp.ne.s32.totalorder %s5410_s24, %s5306_s20  ;;  %p5312_p13 = scmp.lt.s32.totalorder %s5306_s20, %s5306_s20 }
  0x1d   :  { %p5313_p0 = por %p5312_p13, %p5311_p12 }
  0x1f   :  { %p5314_p1 = pnand %p5313_p0, %p5307_p11 }
  0x21   :  { %5317 = shalt.err (!%p5314_p1)
}
  0x22   :  { %27 = dma.hbm_to_vmem [thread:$0]  %s5651_s1, 25088, %s5410_s24, [#allocation3], %s5370_s9, %s5370_s9, %s5371_s10  }
  0x23   :  { %s5372_s22 = smov [#allocation7]   ;;  %s5318_s27 = scalar_lea.hbm %s5653_s3, 16384 }
  0x24   :  { %s45_s23 = sshll.u32 %s5372_s22, 4  ;;  %p5319_p2 = scmp.ne.s32.totalorder %s5653_s3, %s5318_s27  ;;  %s46_s23 = int_to_ptr.vmem [resolvable:$true] %s45_s23 }
  0x25   :  { %p5322_p3 = scmp.lt.u32.totalorder %s5318_s27, %s5653_s3 }
  0x27   :  { %p5324_p4 = pnand %p5322_p3, %p5319_p2 }
  0x29   :  { %5327 = shalt.err (!%p5324_p4)
}
  0x2a   :  { %s5328_s8 = scalar_lea.vmem %s46_s23, 16384  ;;  %p5333_p6 = scmp.lt.s32.totalorder %s46_s23, %s46_s23 }
  0x2b   :  { %p5329_p5 = scmp.ne.s32.totalorder %s46_s23, %s5328_s8  ;;  %p5334_p7 = scmp.lt.s32.totalorder %s5328_s8, %s5328_s8 }
  0x2d   :  { %p5335_p8 = por %p5334_p7, %p5333_p6 }
  0x2f   :  { %p5336_p9 = pnand %p5335_p8, %p5329_p5 }
  0x31   :  { %5339 = shalt.err (!%p5336_p9)
}
  0x32   :  { %51 = dma.hbm_to_vmem [thread:$0]  %s5653_s3, 16384, %s46_s23, [#allocation6], %s5370_s9, %s5370_s9, %s5371_s10  }
  0x33   :  { %5362 = dma.done.wait [#allocation3], 25088  }
  0x34   :  { %5363 = vsyncadd [#allocation3], 4294942208 }
  0x35   :  { %5364 = dma.done.wait [#allocation6], 32768  }
  0x36   :  { %5365 = vsyncadd [#allocation6], 4294934528  ;;  %v4557_v0 = vld [vmem:[#allocation2 + $0x4] ss:$16 sps:$4 sm:$0xff]   ;;  %v4559_v1 = vld [vmem:[#allocation2 + $0xc] ss:$16 sps:$4 sm:$0xff]  }
  0x37   :  { %1296 = vmatprep.subr.bf16.mxu0 %v4557_v0  ;;  %v4561_v2 = vld [vmem:[#allocation2] ss:$16 sps:$4 sm:$0xff]   ;;  %v4562_v3 = vld [vmem:[#allocation2 + $0x8] ss:$16 sps:$4 sm:$0xff]   ;;  %1460 = vmatprep.subr.bf16.mxu1 %v4559_v1  ;;  %v4563_v4 = vld [vmem:[#allocation2 + $0x24] ss:$16 sps:$4 sm:$0xff]  }
  0x38   :  { %1297 = vmatpush1.bf16.msra.mxu0 %v4561_v2  ;;  %1461 = vmatpush1.bf16.msra.mxu1 %v4562_v3  ;;  %v4565_v5 = vld [vmem:[#allocation2 + $0x2c] ss:$16 sps:$4 sm:$0xff]   ;;  %v4567_v6 = vld [vmem:[#allocation2 + $0x20] ss:$16 sps:$4 sm:$0xff]   ;;  %v4568_v7 = vld [vmem:[#allocation2 + $0x28] ss:$16 sps:$4 sm:$0xff]  }
  0x39   :  { %1298 = vmatprep.subr.bf16.mxu0 %v4563_v4  ;;  %1462 = vmatprep.subr.bf16.mxu1 %v4565_v5  ;;  %v4569_v8 = vld [vmem:[#allocation2 + $0x44] ss:$16 sps:$4 sm:$0xff]   ;;  %v4571_v9 = vld [vmem:[#allocation2 + $0x4c] ss:$16 sps:$4 sm:$0xff]   ;;  %v4573_v10 = vld [vmem:[#allocation2 + $0x40] ss:$16 sps:$4 sm:$0xff]  }
  0x3a   :  { %v4574_v11 = vld [vmem:[#allocation2 + $0x48] ss:$16 sps:$4 sm:$0xff]   ;;  %v4575_v12 = vld [vmem:[#allocation2 + $0x64] ss:$16 sps:$4 sm:$0xff]   ;;  %v4577_v13 = vld [vmem:[#allocation2 + $0x6c] ss:$16 sps:$4 sm:$0xff]  }
  0x3b   :  { %v4579_v14 = vld [vmem:[#allocation2 + $0x60] ss:$16 sps:$4 sm:$0xff]   ;;  %v4580_v15 = vld [vmem:[#allocation2 + $0x68] ss:$16 sps:$4 sm:$0xff]   ;;  %v4581_v16 = vld [vmem:[#allocation2 + $0x84] ss:$16 sps:$4 sm:$0xff]  }
  0x3c   :  { %1299 = vmatpush1.bf16.msra.mxu0 %v4567_v6  ;;  %1463 = vmatpush1.bf16.msra.mxu1 %v4568_v7  ;;  %v4583_v17 = vld [vmem:[#allocation2 + $0x8c] ss:$16 sps:$4 sm:$0xff]   ;;  %v4585_v18 = vld [vmem:[#allocation2 + $0x80] ss:$16 sps:$4 sm:$0xff]   ;;  %v4586_v19 = vld [vmem:[#allocation2 + $0x88] ss:$16 sps:$4 sm:$0xff]  }
  0x3d   :  { %1300 = vmatprep.subr.bf16.mxu0 %v4569_v8  ;;  %1464 = vmatprep.subr.bf16.mxu1 %v4571_v9  ;;  %v4587_v20 = vld [vmem:[#allocation2 + $0xa4] ss:$16 sps:$4 sm:$0xff]   ;;  %v4589_v21 = vld [vmem:[#allocation2 + $0xac] ss:$16 sps:$4 sm:$0xff]   ;;  %v4591_v22 = vld [vmem:[#allocation2 + $0xa0] ss:$16 sps:$4 sm:$0xff]  }
  0x3e   :  { %v4592_v23 = vld [vmem:[#allocation2 + $0xa8] ss:$16 sps:$4 sm:$0xff]   ;;  %v4593_v24 = vld [vmem:[#allocation2 + $0xc4] ss:$16 sps:$4 sm:$0xff]   ;;  %v4595_v25 = vld [vmem:[#allocation2 + $0xcc] ss:$16 sps:$4 sm:$0xff]  }
  0x3f   :  { %v4597_v26 = vld [vmem:[#allocation2 + $0xc0] ss:$16 sps:$4 sm:$0xff]   ;;  %v4598_v27 = vld [vmem:[#allocation2 + $0xc8] ss:$16 sps:$4 sm:$0xff]   ;;  %v4599_v28 = vld [vmem:[#allocation2 + $0xe4] ss:$16 sps:$4 sm:$0xff]  }
  0x40   :  { %1301 = vmatpush1.bf16.msra.mxu0 %v4573_v10  ;;  %1465 = vmatpush1.bf16.msra.mxu1 %v4574_v11  ;;  %v4601_v29 = vld [vmem:[#allocation2 + $0xec] ss:$16 sps:$4 sm:$0xff]   ;;  %v4603_v30 = vld [vmem:[#allocation2 + $0xe0] ss:$16 sps:$4 sm:$0xff]   ;;  %v4604_v31 = vld [vmem:[#allocation2 + $0xe8] ss:$16 sps:$4 sm:$0xff]  }
  0x41   :  { %1302 = vmatprep.subr.bf16.mxu0 %v4575_v12  ;;  %1466 = vmatprep.subr.bf16.mxu1 %v4577_v13  ;;  %v4605_v32 = vld [vmem:[#allocation2 + $0x104] ss:$16 sps:$4 sm:$0xff]   ;;  %v4607_v33 = vld [vmem:[#allocation2 + $0x10c] ss:$16 sps:$4 sm:$0xff]   ;;  %v4609_v34 = vld [vmem:[#allocation2 + $0x100] ss:$16 sps:$4 sm:$0xff]  }
  0x42   :  { %v4610_v35 = vld [vmem:[#allocation2 + $0x108] ss:$16 sps:$4 sm:$0xff]   ;;  %v4611_v36 = vld [vmem:[#allocation2 + $0x124] ss:$16 sps:$4 sm:$0xff]   ;;  %v4613_v37 = vld [vmem:[#allocation2 + $0x12c] ss:$16 sps:$4 sm:$0xff]  }
  0x43   :  { %v4615_v38 = vld [vmem:[#allocation2 + $0x120] ss:$16 sps:$4 sm:$0xff]   ;;  %v4616_v39 = vld [vmem:[#allocation2 + $0x128] ss:$16 sps:$4 sm:$0xff]   ;;  %v4617_v40 = vld [vmem:[#allocation2 + $0x144] ss:$16 sps:$4 sm:$0xff]  }
  0x44   :  { %1303 = vmatpush1.bf16.msra.mxu0 %v4579_v14  ;;  %1467 = vmatpush1.bf16.msra.mxu1 %v4580_v15  ;;  %v4619_v41 = vld [vmem:[#allocation2 + $0x14c] ss:$16 sps:$4 sm:$0xff]   ;;  %v4621_v42 = vld [vmem:[#allocation2 + $0x140] ss:$16 sps:$4 sm:$0xff]   ;;  %v4622_v43 = vld [vmem:[#allocation2 + $0x148] ss:$16 sps:$4 sm:$0xff]  }
  0x45   :  { %1304 = vmatprep.subr.bf16.mxu0 %v4581_v16  ;;  %1468 = vmatprep.subr.bf16.mxu1 %v4583_v17  ;;  %v4623_v44 = vld [vmem:[#allocation2 + $0x164] ss:$16 sps:$4 sm:$0xff]   ;;  %v4625_v45 = vld [vmem:[#allocation2 + $0x16c] ss:$16 sps:$4 sm:$0xff]   ;;  %v4627_v47 = vld [vmem:[#allocation2 + $0x160] ss:$16 sps:$4 sm:$0xff]  }
  0x46   :  { %v66_v46 = vld [vmem:[%s5650_s0] sm:$0xff]  ;;  %v4628_v49 = vld [vmem:[#allocation2 + $0x168] ss:$16 sps:$4 sm:$0xff]   ;;  %v4631_v51 = vld [vmem:[#allocation2 + $0x18c] ss:$16 sps:$4 sm:$0xff]   ;;  %vm1292_vm0 = vcmask 130048  }
  0x47   :  { %v3951_v48 = vcombine.high %v66_v46, %v66_v46  ;;  %v4629_v50 = vld [vmem:[#allocation2 + $0x184] ss:$16 sps:$4 sm:$0xff]   ;;  %v4633_v52 = vld [vmem:[#allocation2 + $0x180] ss:$16 sps:$4 sm:$0xff]   ;;  %v4634_v53 = vld [vmem:[#allocation2 + $0x188] ss:$16 sps:$4 sm:$0xff]   ;;  %v3950_v4 = vcombine.low %v66_v46, %v66_v46 }
  0x48   :  { %1305 = vmatpush1.bf16.msra.mxu0 %v4585_v18  ;;  %1469 = vmatpush1.bf16.msra.mxu1 %v4586_v19  ;;  %v4635_v54 = vld [vmem:[#allocation2 + $0x1a4] ss:$16 sps:$4 sm:$0xff]   ;;  %v4637_v55 = vld [vmem:[#allocation2 + $0x1ac] ss:$16 sps:$4 sm:$0xff]   ;;  %v4639_v56 = vld [vmem:[#allocation2 + $0x1a0] ss:$16 sps:$4 sm:$0xff]  }
  0x49   :  { %1306 = vmatprep.subr.bf16.mxu0 %v4587_v20  ;;  %1470 = vmatprep.subr.bf16.mxu1 %v4589_v21  ;;  %v4640_v57 = vld [vmem:[#allocation2 + $0x1a8] ss:$16 sps:$4 sm:$0xff]   ;;  %v4641_v58 = vld [vmem:[#allocation2 + $0x1c4] ss:$16 sps:$4 sm:$0xff]   ;;  %v4643_v59 = vld [vmem:[#allocation2 + $0x1cc] ss:$16 sps:$4 sm:$0xff]  }
  0x4a   :  { %1328 = vmatprep.mubr.bf16.mxu0 %v3951_v48  ;;  %1492 = vmatprep.mubr.bf16.mxu1 %v3951_v48  ;;  %v4645_v60 = vld [vmem:[#allocation2 + $0x1c0] ss:$16 sps:$4 sm:$0xff]   ;;  %v4646_v61 = vld [vmem:[#allocation2 + $0x1c8] ss:$16 sps:$4 sm:$0xff]   ;;  %v4647_v62 = vld [vmem:[#allocation2 + $0x1e4] ss:$16 sps:$4 sm:$0xff]  }
  0x4b   :  { %v4649_v63 = vld [vmem:[#allocation2 + $0x1ec] ss:$16 sps:$4 sm:$0xff]   ;;  %v4651_v0 = vld [vmem:[#allocation2 + $0x1e0] ss:$16 sps:$4 sm:$0xff]   ;;  %v4652_v1 = vld [vmem:[#allocation2 + $0x1e8] ss:$16 sps:$4 sm:$0xff]  }
  0x4c   :  { %1307 = vmatpush1.bf16.msra.mxu0 %v4591_v22  ;;  %1471 = vmatpush1.bf16.msra.mxu1 %v4592_v23  ;;  %v4657_v2 = vld [vmem:[#allocation2 + $0x204] ss:$16 sps:$4 sm:$0xff]   ;;  %v4660_v3 = vld [vmem:[#allocation2 + $0x20c] ss:$16 sps:$4 sm:$0xff]   ;;  %v4655_v5 = vld [vmem:[#allocation2 + $0x200] ss:$16 sps:$4 sm:$0xff]  }
  0x4d   :  { %1308 = vmatprep.subr.bf16.mxu0 %v4593_v24  ;;  %1472 = vmatprep.subr.bf16.mxu1 %v4595_v25  ;;  %v4658_v6 = vld [vmem:[#allocation2 + $0x208] ss:$16 sps:$4 sm:$0xff]   ;;  %v4663_v7 = vld [vmem:[#allocation2 + $0x224] ss:$16 sps:$4 sm:$0xff]   ;;  %v4666_v8 = vld [vmem:[#allocation2 + $0x22c] ss:$16 sps:$4 sm:$0xff]  }
  0x4e   :  { %v4661_v9 = vld [vmem:[#allocation2 + $0x220] ss:$16 sps:$4 sm:$0xff]   ;;  %v4664_v10 = vld [vmem:[#allocation2 + $0x228] ss:$16 sps:$4 sm:$0xff]   ;;  %v4669_v11 = vld [vmem:[#allocation2 + $0x244] ss:$16 sps:$4 sm:$0xff]  }
  0x4f   :  { %v4672_v12 = vld [vmem:[#allocation2 + $0x24c] ss:$16 sps:$4 sm:$0xff]   ;;  %v4667_v13 = vld [vmem:[#allocation2 + $0x240] ss:$16 sps:$4 sm:$0xff]   ;;  %v4670_v14 = vld [vmem:[#allocation2 + $0x248] ss:$16 sps:$4 sm:$0xff]  }
  0x50   :  { %1309 = vmatpush1.bf16.msra.mxu0 %v4597_v26  ;;  %1473 = vmatpush1.bf16.msra.mxu1 %v4598_v27  ;;  %v4675_v15 = vld [vmem:[#allocation2 + $0x264] ss:$16 sps:$4 sm:$0xff]   ;;  %v4678_v16 = vld [vmem:[#allocation2 + $0x26c] ss:$16 sps:$4 sm:$0xff]   ;;  %v4673_v17 = vld [vmem:[#allocation2 + $0x260] ss:$16 sps:$4 sm:$0xff]  }
  0x51   :  { %1310 = vmatprep.subr.bf16.mxu0 %v4599_v28  ;;  %1474 = vmatprep.subr.bf16.mxu1 %v4601_v29  ;;  %v4676_v18 = vld [vmem:[#allocation2 + $0x268] ss:$16 sps:$4 sm:$0xff]   ;;  %v4681_v19 = vld [vmem:[#allocation2 + $0x284] ss:$16 sps:$4 sm:$0xff]   ;;  %v4684_v20 = vld [vmem:[#allocation2 + $0x28c] ss:$16 sps:$4 sm:$0xff]  }
  0x52   :  { %v4679_v21 = vld [vmem:[#allocation2 + $0x280] ss:$16 sps:$4 sm:$0xff]   ;;  %v4682_v22 = vld [vmem:[#allocation2 + $0x288] ss:$16 sps:$4 sm:$0xff]   ;;  %v4687_v23 = vld [vmem:[#allocation2 + $0x2a4] ss:$16 sps:$4 sm:$0xff]  }
  0x53   :  { %v4690_v24 = vld [vmem:[#allocation2 + $0x2ac] ss:$16 sps:$4 sm:$0xff]   ;;  %v4685_v25 = vld [vmem:[#allocation2 + $0x2a0] ss:$16 sps:$4 sm:$0xff]   ;;  %v4688_v26 = vld [vmem:[#allocation2 + $0x2a8] ss:$16 sps:$4 sm:$0xff]  }
  0x54   :  { %1311 = vmatpush1.bf16.msra.mxu0 %v4603_v30  ;;  %1475 = vmatpush1.bf16.msra.mxu1 %v4604_v31  ;;  %v4693_v27 = vld [vmem:[#allocation2 + $0x2c4] ss:$16 sps:$4 sm:$0xff]   ;;  %v4696_v28 = vld [vmem:[#allocation2 + $0x2cc] ss:$16 sps:$4 sm:$0xff]   ;;  %v4691_v31 = vld [vmem:[#allocation2 + $0x2c0] ss:$16 sps:$4 sm:$0xff]  }
  0x55   :  { %1312 = vmatprep.subr.bf16.mxu0 %v4605_v32  ;;  %1476 = vmatprep.subr.bf16.mxu1 %v4607_v33  ;;  %v5468_v29 = vld [vmem:[%s5650_s0 + $0x8] sm:$0xff]  ;;  %v4699_v33 = vld [vmem:[#allocation2 + $0x2e4] ss:$16 sps:$4 sm:$0xff]   ;;  %s5374_s30 = smov [#allocation8]   ;;  %vm3932_vm1 = vcmask 80896  }
  0x56   :  { %v3953_v30 = vcombine.high %v5468_v29, %v5468_v29  ;;  %v4694_v32 = vld [vmem:[#allocation2 + $0x2c8] ss:$16 sps:$4 sm:$0xff]   ;;  %v4720_v46 = vld [vmem:[#allocation2 + $0x34c] ss:$16 sps:$4 sm:$0xff]   ;;  %s3940_s7 = sshll.u32 %s5374_s30, 4  ;;  %s3941_s7 = int_to_ptr.vmem [resolvable:$true] %s3940_s7 }
  0x57   :  { %v4718_v48 = vld [vmem:[#allocation2 + $0x348] ss:$16 sps:$4 sm:$0xff]   ;;  %s5340_s8 = scalar_lea.vmem %s3941_s7, 128  ;;  %p5345_p11 = scmp.lt.s32.totalorder %s3941_s7, %s3941_s7 }
  0x58   :  { %1313 = vmatpush1.bf16.msra.mxu0 %v4609_v34  ;;  %1477 = vmatpush1.bf16.msra.mxu1 %v4610_v35  ;;  %v4702_v34 = vld [vmem:[#allocation2 + $0x2ec] ss:$16 sps:$4 sm:$0xff]   ;;  %v4697_v35 = vld [vmem:[#allocation2 + $0x2e0] ss:$16 sps:$4 sm:$0xff]   ;;  %p5341_p10 = scmp.ne.s32.totalorder %s3941_s7, %s5340_s8  ;;  %p5346_p12 = scmp.lt.s32.totalorder %s5340_s8, %s5340_s8 }
  0x59   :  { %1314 = vmatprep.subr.bf16.mxu0 %v4611_v36  ;;  %1478 = vmatprep.subr.bf16.mxu1 %v4613_v37  ;;  %v4700_v36 = vld [vmem:[#allocation2 + $0x2e8] ss:$16 sps:$4 sm:$0xff]   ;;  %v4705_v37 = vld [vmem:[#allocation2 + $0x304] ss:$16 sps:$4 sm:$0xff]  }
  0x5a   :  { %p5347_p13 = por %p5346_p12, %p5345_p11 }
  0x5c   :  { %1315 = vmatpush1.bf16.msra.mxu0 %v4615_v38  ;;  %1479 = vmatpush1.bf16.msra.mxu1 %v4616_v39  ;;  %v4708_v38 = vld [vmem:[#allocation2 + $0x30c] ss:$16 sps:$4 sm:$0xff]   ;;  %v4703_v39 = vld [vmem:[#allocation2 + $0x300] ss:$16 sps:$4 sm:$0xff]   ;;  %p5348_p0 = pnand %p5347_p13, %p5341_p10 }
  0x5d   :  { %1316 = vmatprep.subr.bf16.mxu0 %v4617_v40  ;;  %1480 = vmatprep.subr.bf16.mxu1 %v4619_v41  ;;  %v4706_v40 = vld [vmem:[#allocation2 + $0x308] ss:$16 sps:$4 sm:$0xff]   ;;  %v4711_v41 = vld [vmem:[#allocation2 + $0x324] ss:$16 sps:$4 sm:$0xff]  }
  0x60   :  { %1317 = vmatpush1.bf16.msra.mxu0 %v4621_v42  ;;  %1481 = vmatpush1.bf16.msra.mxu1 %v4622_v43  ;;  %v4714_v42 = vld [vmem:[#allocation2 + $0x32c] ss:$16 sps:$4 sm:$0xff]   ;;  %v4709_v43 = vld [vmem:[#allocation2 + $0x320] ss:$16 sps:$4 sm:$0xff]  }
  0x61   :  { %1318 = vmatprep.subr.bf16.mxu0 %v4623_v44  ;;  %1482 = vmatprep.subr.bf16.mxu1 %v4625_v45  ;;  %v4712_v44 = vld [vmem:[#allocation2 + $0x328] ss:$16 sps:$4 sm:$0xff]   ;;  %v4717_v45 = vld [vmem:[#allocation2 + $0x344] ss:$16 sps:$4 sm:$0xff]  }
  0x64   :  { %1319 = vmatpush1.bf16.msra.mxu0 %v4627_v47  ;;  %1483 = vmatpush1.bf16.msra.mxu1 %v4628_v49  ;;  %v4715_v47 = vld [vmem:[#allocation2 + $0x340] ss:$16 sps:$4 sm:$0xff]   ;;  %v4723_v49 = vld [vmem:[#allocation2 + $0x364] ss:$16 sps:$4 sm:$0xff]  }
  0x65   :  { %1320 = vmatprep.subr.bf16.mxu0 %v4629_v50  ;;  %1484 = vmatprep.subr.bf16.mxu1 %v4631_v51  ;;  %v4726_v50 = vld [vmem:[#allocation2 + $0x36c] ss:$16 sps:$4 sm:$0xff]   ;;  %v4721_v51 = vld [vmem:[#allocation2 + $0x360] ss:$16 sps:$4 sm:$0xff]  }
  0x68   :  { %1321 = vmatpush1.bf16.msra.mxu0 %v4633_v52  ;;  %1485 = vmatpush1.bf16.msra.mxu1 %v4634_v53  ;;  %v4724_v52 = vld [vmem:[#allocation2 + $0x368] ss:$16 sps:$4 sm:$0xff]   ;;  %v4729_v53 = vld [vmem:[#allocation2 + $0x384] ss:$16 sps:$4 sm:$0xff]  }
  0x69   :  { %1322 = vmatprep.subr.bf16.mxu0 %v4635_v54  ;;  %1486 = vmatprep.subr.bf16.mxu1 %v4637_v55  ;;  %v4732_v54 = vld [vmem:[#allocation2 + $0x38c] ss:$16 sps:$4 sm:$0xff]   ;;  %v4727_v55 = vld [vmem:[#allocation2 + $0x380] ss:$16 sps:$4 sm:$0xff]  }
  0x6c   :  { %1323 = vmatpush1.bf16.msra.mxu0 %v4639_v56  ;;  %1487 = vmatpush1.bf16.msra.mxu1 %v4640_v57  ;;  %v4730_v56 = vld [vmem:[#allocation2 + $0x388] ss:$16 sps:$4 sm:$0xff]   ;;  %v4735_v57 = vld [vmem:[#allocation2 + $0x3a4] ss:$16 sps:$4 sm:$0xff]  }
  0x6d   :  { %1324 = vmatprep.subr.bf16.mxu0 %v4641_v58  ;;  %1488 = vmatprep.subr.bf16.mxu1 %v4643_v59  ;;  %v4738_v58 = vld [vmem:[#allocation2 + $0x3ac] ss:$16 sps:$4 sm:$0xff]   ;;  %v4733_v59 = vld [vmem:[#allocation2 + $0x3a0] ss:$16 sps:$4 sm:$0xff]  }
  0x70   :  { %1325 = vmatpush1.bf16.msra.mxu0 %v4645_v60  ;;  %1489 = vmatpush1.bf16.msra.mxu1 %v4646_v61  ;;  %v4736_v60 = vld [vmem:[#allocation2 + $0x3a8] ss:$16 sps:$4 sm:$0xff]   ;;  %v4741_v61 = vld [vmem:[#allocation2 + $0x3c4] ss:$16 sps:$4 sm:$0xff]  }
  0x71   :  { %1326 = vmatprep.subr.bf16.mxu0 %v4647_v62  ;;  %1490 = vmatprep.subr.bf16.mxu1 %v4649_v63  ;;  %v4744_v62 = vld [vmem:[#allocation2 + $0x3cc] ss:$16 sps:$4 sm:$0xff]   ;;  %v4739_v63 = vld [vmem:[#allocation2 + $0x3c0] ss:$16 sps:$4 sm:$0xff]  }
  0x74   :  { %1327 = vmatpush1.bf16.msra.mxu0 %v4651_v0  ;;  %1491 = vmatpush1.bf16.msra.mxu1 %v4652_v1  ;;  %v4742_v0 = vld [vmem:[#allocation2 + $0x3c8] ss:$16 sps:$4 sm:$0xff]   ;;  %v4747_v1 = vld [vmem:[#allocation2 + $0x3e4] ss:$16 sps:$4 sm:$0xff]  }
  0x75   :  { %1337 = vmatprep.subr.bf16.mxu0 %v4657_v2  ;;  %1501 = vmatprep.subr.bf16.mxu1 %v4660_v3  ;;  %v4750_v2 = vld [vmem:[#allocation2 + $0x3ec] ss:$16 sps:$4 sm:$0xff]   ;;  %v4745_v3 = vld [vmem:[#allocation2 + $0x3e0] ss:$16 sps:$4 sm:$0xff]  }
  0x77   :  { %1329 = vmatmul.mubr.bf16.vlgmr.msra.gmra.mrb[0].mxu0 %v3950_v4  ;;  %1493 = vmatmul.mubr.bf16.vlgmr.msra.gmra.mrb[0].mxu1 %v3950_v4  ;;  %v4748_v4 = vld [vmem:[#allocation2 + $0x3e8] ss:$16 sps:$4 sm:$0xff]  }
  0x78   :  { %1338 = vmatpush1.bf16.msra.mxu0 %v4655_v5  ;;  %1502 = vmatpush1.bf16.msra.mxu1 %v4658_v6  ;;  %v4755_v5 = vld [vmem:[#allocation2 + $0x404] ss:$16 sps:$4 sm:$0xff]   ;;  %v4758_v6 = vld [vmem:[#allocation2 + $0x40c] ss:$16 sps:$4 sm:$0xff]  }
  0x79   :  { %1339 = vmatprep.subr.bf16.mxu0 %v4663_v7  ;;  %1503 = vmatprep.subr.bf16.mxu1 %v4666_v8  ;;  %v3952_v7 = vcombine.low %v5468_v29, %v5468_v29  ;;  %v4753_v8 = vld [vmem:[#allocation2 + $0x400] ss:$16 sps:$4 sm:$0xff]   ;;  %v4788_v29 = vld [vmem:[#allocation2 + $0x4ac] ss:$16 sps:$4 sm:$0xff]  }
  0x7a   :  { %1369 = vmatprep.mubr.bf16.mxu0 %v3953_v30  ;;  %1533 = vmatprep.mubr.bf16.mxu1 %v3953_v30  ;;  %v4783_v30 = vld [vmem:[#allocation2 + $0x4a0] ss:$16 sps:$4 sm:$0xff]  }
  0x7c   :  { %1340 = vmatpush1.bf16.msra.mxu0 %v4661_v9  ;;  %1504 = vmatpush1.bf16.msra.mxu1 %v4664_v10  ;;  %v4756_v9 = vld [vmem:[#allocation2 + $0x408] ss:$16 sps:$4 sm:$0xff]   ;;  %v4761_v10 = vld [vmem:[#allocation2 + $0x424] ss:$16 sps:$4 sm:$0xff]  }
  0x7d   :  { %1341 = vmatprep.subr.bf16.mxu0 %v4669_v11  ;;  %1505 = vmatprep.subr.bf16.mxu1 %v4672_v12  ;;  %v5477_v11 = vld [vmem:[%s5650_s0 + $0x10] sm:$0xff]  ;;  %v4764_v12 = vld [vmem:[#allocation2 + $0x42c] ss:$16 sps:$4 sm:$0xff]  }
  0x80   :  { %1342 = vmatpush1.bf16.msra.mxu0 %v4667_v13  ;;  %1506 = vmatpush1.bf16.msra.mxu1 %v4670_v14  ;;  %v3955_v13 = vcombine.high %v5477_v11, %v5477_v11  ;;  %v4759_v14 = vld [vmem:[#allocation2 + $0x420] ss:$16 sps:$4 sm:$0xff]  }
  0x81   :  { %1343 = vmatprep.subr.bf16.mxu0 %v4675_v15  ;;  %1507 = vmatprep.subr.bf16.mxu1 %v4678_v16  ;;  %v4762_v15 = vld [vmem:[#allocation2 + $0x428] ss:$16 sps:$4 sm:$0xff]   ;;  %v4767_v16 = vld [vmem:[#allocation2 + $0x444] ss:$16 sps:$4 sm:$0xff]  }
  0x84   :  { %1344 = vmatpush1.bf16.msra.mxu0 %v4673_v17  ;;  %1508 = vmatpush1.bf16.msra.mxu1 %v4676_v18  ;;  %v4770_v17 = vld [vmem:[#allocation2 + $0x44c] ss:$16 sps:$4 sm:$0xff]   ;;  %v4765_v18 = vld [vmem:[#allocation2 + $0x440] ss:$16 sps:$4 sm:$0xff]  }
  0x85   :  { %1345 = vmatprep.subr.bf16.mxu0 %v4681_v19  ;;  %1509 = vmatprep.subr.bf16.mxu1 %v4684_v20  ;;  %v4768_v19 = vld [vmem:[#allocation2 + $0x448] ss:$16 sps:$4 sm:$0xff]   ;;  %v4773_v20 = vld [vmem:[#allocation2 + $0x464] ss:$16 sps:$4 sm:$0xff]  }
  0x88   :  { %1346 = vmatpush1.bf16.msra.mxu0 %v4679_v21  ;;  %1510 = vmatpush1.bf16.msra.mxu1 %v4682_v22  ;;  %v4776_v21 = vld [vmem:[#allocation2 + $0x46c] ss:$16 sps:$4 sm:$0xff]   ;;  %v4771_v22 = vld [vmem:[#allocation2 + $0x460] ss:$16 sps:$4 sm:$0xff]  }
  0x89   :  { %1347 = vmatprep.subr.bf16.mxu0 %v4687_v23  ;;  %1511 = vmatprep.subr.bf16.mxu1 %v4690_v24  ;;  %v4774_v23 = vld [vmem:[#allocation2 + $0x468] ss:$16 sps:$4 sm:$0xff]   ;;  %v4779_v24 = vld [vmem:[#allocation2 + $0x484] ss:$16 sps:$4 sm:$0xff]  }
  0x8c   :  { %1348 = vmatpush1.bf16.msra.mxu0 %v4685_v25  ;;  %1512 = vmatpush1.bf16.msra.mxu1 %v4688_v26  ;;  %v4782_v25 = vld [vmem:[#allocation2 + $0x48c] ss:$16 sps:$4 sm:$0xff]   ;;  %v4777_v26 = vld [vmem:[#allocation2 + $0x480] ss:$16 sps:$4 sm:$0xff]  }
  0x8d   :  { %1349 = vmatprep.subr.bf16.mxu0 %v4693_v27  ;;  %1513 = vmatprep.subr.bf16.mxu1 %v4696_v28  ;;  %v4780_v27 = vld [vmem:[#allocation2 + $0x488] ss:$16 sps:$4 sm:$0xff]   ;;  %v4785_v28 = vld [vmem:[#allocation2 + $0x4a4] ss:$16 sps:$4 sm:$0xff]  }
  0x90   :  { %1350 = vmatpush1.bf16.msra.mxu0 %v4691_v31  ;;  %1514 = vmatpush1.bf16.msra.mxu1 %v4694_v32  ;;  %v4786_v31 = vld [vmem:[#allocation2 + $0x4a8] ss:$16 sps:$4 sm:$0xff]   ;;  %v4791_v32 = vld [vmem:[#allocation2 + $0x4c4] ss:$16 sps:$4 sm:$0xff]  }
  0x91   :  { %1351 = vmatprep.subr.bf16.mxu0 %v4699_v33  ;;  %1515 = vmatprep.subr.bf16.mxu1 %v4702_v34  ;;  %v4794_v33 = vld [vmem:[#allocation2 + $0x4cc] ss:$16 sps:$4 sm:$0xff]   ;;  %v4789_v34 = vld [vmem:[#allocation2 + $0x4c0] ss:$16 sps:$4 sm:$0xff]  }
  0x94   :  { %1352 = vmatpush1.bf16.msra.mxu0 %v4697_v35  ;;  %1516 = vmatpush1.bf16.msra.mxu1 %v4700_v36  ;;  %v4792_v35 = vld [vmem:[#allocation2 + $0x4c8] ss:$16 sps:$4 sm:$0xff]   ;;  %v4797_v36 = vld [vmem:[#allocation2 + $0x4e4] ss:$16 sps:$4 sm:$0xff]  }
  0x95   :  { %1353 = vmatprep.subr.bf16.mxu0 %v4705_v37  ;;  %1517 = vmatprep.subr.bf16.mxu1 %v4708_v38  ;;  %v4800_v37 = vld [vmem:[#allocation2 + $0x4ec] ss:$16 sps:$4 sm:$0xff]   ;;  %v4795_v38 = vld [vmem:[#allocation2 + $0x4e0] ss:$16 sps:$4 sm:$0xff]  }
  0x98   :  { %1354 = vmatpush1.bf16.msra.mxu0 %v4703_v39  ;;  %1518 = vmatpush1.bf16.msra.mxu1 %v4706_v40  ;;  %v4798_v39 = vld [vmem:[#allocation2 + $0x4e8] ss:$16 sps:$4 sm:$0xff]   ;;  %v4803_v40 = vld [vmem:[#allocation2 + $0x504] ss:$16 sps:$4 sm:$0xff]  }
  0x99   :  { %1355 = vmatprep.subr.bf16.mxu0 %v4711_v41  ;;  %1519 = vmatprep.subr.bf16.mxu1 %v4714_v42  ;;  %v4806_v41 = vld [vmem:[#allocation2 + $0x50c] ss:$16 sps:$4 sm:$0xff]   ;;  %v4801_v42 = vld [vmem:[#allocation2 + $0x500] ss:$16 sps:$4 sm:$0xff]  }
  0x9c   :  { %1356 = vmatpush1.bf16.msra.mxu0 %v4709_v43  ;;  %1520 = vmatpush1.bf16.msra.mxu1 %v4712_v44  ;;  %v4804_v43 = vld [vmem:[#allocation2 + $0x508] ss:$16 sps:$4 sm:$0xff]   ;;  %v4809_v44 = vld [vmem:[#allocation2 + $0x524] ss:$16 sps:$4 sm:$0xff]  }
  0x9d   :  { %1357 = vmatprep.subr.bf16.mxu0 %v4717_v45  ;;  %1521 = vmatprep.subr.bf16.mxu1 %v4720_v46  ;;  %v4812_v45 = vld [vmem:[#allocation2 + $0x52c] ss:$16 sps:$4 sm:$0xff]   ;;  %v4807_v46 = vld [vmem:[#allocation2 + $0x520] ss:$16 sps:$4 sm:$0xff]  }
  0xa0   :  { %1358 = vmatpush1.bf16.msra.mxu0 %v4715_v47  ;;  %1522 = vmatpush1.bf16.msra.mxu1 %v4718_v48  ;;  %v4810_v47 = vld [vmem:[#allocation2 + $0x528] ss:$16 sps:$4 sm:$0xff]   ;;  %v4815_v48 = vld [vmem:[#allocation2 + $0x544] ss:$16 sps:$4 sm:$0xff]  }
  0xa1   :  { %1359 = vmatprep.subr.bf16.mxu0 %v4723_v49  ;;  %1523 = vmatprep.subr.bf16.mxu1 %v4726_v50  ;;  %v4818_v49 = vld [vmem:[#allocation2 + $0x54c] ss:$16 sps:$4 sm:$0xff]   ;;  %v4813_v50 = vld [vmem:[#allocation2 + $0x540] ss:$16 sps:$4 sm:$0xff]  }
  0xa4   :  { %1360 = vmatpush1.bf16.msra.mxu0 %v4721_v51  ;;  %1524 = vmatpush1.bf16.msra.mxu1 %v4724_v52  ;;  %v4816_v51 = vld [vmem:[#allocation2 + $0x548] ss:$16 sps:$4 sm:$0xff]   ;;  %v4821_v52 = vld [vmem:[#allocation2 + $0x564] ss:$16 sps:$4 sm:$0xff]  }
  0xa5   :  { %1361 = vmatprep.subr.bf16.mxu0 %v4729_v53  ;;  %1525 = vmatprep.subr.bf16.mxu1 %v4732_v54  ;;  %v4824_v53 = vld [vmem:[#allocation2 + $0x56c] ss:$16 sps:$4 sm:$0xff]   ;;  %v4819_v54 = vld [vmem:[#allocation2 + $0x560] ss:$16 sps:$4 sm:$0xff]  }
  0xa8   :  { %1362 = vmatpush1.bf16.msra.mxu0 %v4727_v55  ;;  %1526 = vmatpush1.bf16.msra.mxu1 %v4730_v56  ;;  %v4822_v55 = vld [vmem:[#allocation2 + $0x568] ss:$16 sps:$4 sm:$0xff]   ;;  %v4827_v56 = vld [vmem:[#allocation2 + $0x584] ss:$16 sps:$4 sm:$0xff]  }
  0xa9   :  { %1363 = vmatprep.subr.bf16.mxu0 %v4735_v57  ;;  %1527 = vmatprep.subr.bf16.mxu1 %v4738_v58  ;;  %v4830_v57 = vld [vmem:[#allocation2 + $0x58c] ss:$16 sps:$4 sm:$0xff]   ;;  %v4825_v58 = vld [vmem:[#allocation2 + $0x580] ss:$16 sps:$4 sm:$0xff]  }
  0xac   :  { %1364 = vmatpush1.bf16.msra.mxu0 %v4733_v59  ;;  %1528 = vmatpush1.bf16.msra.mxu1 %v4736_v60  ;;  %v4828_v59 = vld [vmem:[#allocation2 + $0x588] ss:$16 sps:$4 sm:$0xff]   ;;  %v4833_v60 = vld [vmem:[#allocation2 + $0x5a4] ss:$16 sps:$4 sm:$0xff]  }
  0xad   :  { %1365 = vmatprep.subr.bf16.mxu0 %v4741_v61  ;;  %1529 = vmatprep.subr.bf16.mxu1 %v4744_v62  ;;  %v4836_v61 = vld [vmem:[#allocation2 + $0x5ac] ss:$16 sps:$4 sm:$0xff]   ;;  %v4831_v62 = vld [vmem:[#allocation2 + $0x5a0] ss:$16 sps:$4 sm:$0xff]  }
  0xb0   :  { %1366 = vmatpush1.bf16.msra.mxu0 %v4739_v63  ;;  %1530 = vmatpush1.bf16.msra.mxu1 %v4742_v0  ;;  %v4834_v63 = vld [vmem:[#allocation2 + $0x5a8] ss:$16 sps:$4 sm:$0xff]   ;;  %v4839_v0 = vld [vmem:[#allocation2 + $0x5c4] ss:$16 sps:$4 sm:$0xff]  }
  0xb1   :  { %1367 = vmatprep.subr.bf16.mxu0 %v4747_v1  ;;  %1531 = vmatprep.subr.bf16.mxu1 %v4750_v2  ;;  %v4842_v1 = vld [vmem:[#allocation2 + $0x5cc] ss:$16 sps:$4 sm:$0xff]   ;;  %v4837_v2 = vld [vmem:[#allocation2 + $0x5c0] ss:$16 sps:$4 sm:$0xff]  }
  0xb4   :  { %1368 = vmatpush1.bf16.msra.mxu0 %v4745_v3  ;;  %1532 = vmatpush1.bf16.msra.mxu1 %v4748_v4  ;;  %v4840_v3 = vld [vmem:[#allocation2 + $0x5c8] ss:$16 sps:$4 sm:$0xff]   ;;  %v4845_v4 = vld [vmem:[#allocation2 + $0x5e4] ss:$16 sps:$4 sm:$0xff]  }
  0xb5   :  { %1378 = vmatprep.subr.bf16.mxu0 %v4755_v5  ;;  %1542 = vmatprep.subr.bf16.mxu1 %v4758_v6  ;;  %v4848_v5 = vld [vmem:[#allocation2 + $0x5ec] ss:$16 sps:$4 sm:$0xff]   ;;  %v4843_v6 = vld [vmem:[#allocation2 + $0x5e0] ss:$16 sps:$4 sm:$0xff]  }
  0xb7   :  { %1370 = vmatmul.mubr.bf16.vlgmr.msra.gmra.mrb[0].mxu0 %v3952_v7  ;;  %1534 = vmatmul.mubr.bf16.vlgmr.msra.gmra.mrb[0].mxu1 %v3952_v7  ;;  %v4846_v7 = vld [vmem:[#allocation2 + $0x5e8] ss:$16 sps:$4 sm:$0xff]  }
  0xb8   :  { %1379 = vmatpush1.bf16.msra.mxu0 %v4753_v8  ;;  %1543 = vmatpush1.bf16.msra.mxu1 %v4756_v9  ;;  %v4853_v8 = vld [vmem:[#allocation2 + $0x604] ss:$16 sps:$4 sm:$0xff]   ;;  %v4856_v9 = vld [vmem:[#allocation2 + $0x60c] ss:$16 sps:$4 sm:$0xff]  }
  0xb9   :  { %1380 = vmatprep.subr.bf16.mxu0 %v4761_v10  ;;  %1544 = vmatprep.subr.bf16.mxu1 %v4764_v12  ;;  %v4851_v10 = vld [vmem:[#allocation2 + $0x600] ss:$16 sps:$4 sm:$0xff]   ;;  %v4854_v12 = vld [vmem:[#allocation2 + $0x608] ss:$16 sps:$4 sm:$0xff]  }
  0xba   :  { %1410 = vmatprep.mubr.bf16.mxu0 %v3955_v13  ;;  %1574 = vmatprep.mubr.bf16.mxu1 %v3955_v13  ;;  %v3954_v13 = vcombine.low %v5477_v11, %v5477_v11  ;;  %v4858_v11 = vld [vmem:[#allocation5] ss:$16 sps:$4 sm:$0xff]  }
  0xbc   :  { %1381 = vmatpush1.bf16.msra.mxu0 %v4759_v14  ;;  %1545 = vmatpush1.bf16.msra.mxu1 %v4762_v15  ;;  %v4860_v14 = vld [vmem:[#allocation5 + $0x4] ss:$16 sps:$4 sm:$0xff]   ;;  %v4863_v15 = vld [vmem:[#allocation5 + $0xc] ss:$16 sps:$4 sm:$0xff]  }
  0xbd   :  { %1382 = vmatprep.subr.bf16.mxu0 %v4767_v16  ;;  %1546 = vmatprep.subr.bf16.mxu1 %v4770_v17  ;;  %v5373_v16 = vmov 0   ;;  %v4857_v17 = vld [vmem:[%s5650_s0 + $0x18] ss:$0 sps:$4 sm:$0xff]  }
  0xc0   :  { %1383 = vmatpush1.bf16.msra.mxu0 %v4765_v18  ;;  %1547 = vmatpush1.bf16.msra.mxu1 %v4768_v19  ;;  %v4861_v18 = vld [vmem:[#allocation5 + $0x8] ss:$16 sps:$4 sm:$0xff]   ;;  %v4866_v19 = vld [vmem:[#allocation5 + $0x24] ss:$16 sps:$4 sm:$0xff]  }
  0xc1   :  { %1384 = vmatprep.subr.bf16.mxu0 %v4773_v20  ;;  %1548 = vmatprep.subr.bf16.mxu1 %v4776_v21  ;;  %v4869_v20 = vld [vmem:[#allocation5 + $0x2c] ss:$16 sps:$4 sm:$0xff]   ;;  %v4864_v21 = vld [vmem:[#allocation5 + $0x20] ss:$16 sps:$4 sm:$0xff]  }
  0xc4   :  { %1385 = vmatpush1.bf16.msra.mxu0 %v4771_v22  ;;  %1549 = vmatpush1.bf16.msra.mxu1 %v4774_v23  ;;  %v4867_v22 = vld [vmem:[#allocation5 + $0x28] ss:$16 sps:$4 sm:$0xff]   ;;  %v4872_v23 = vld [vmem:[#allocation5 + $0x44] ss:$16 sps:$4 sm:$0xff]  }
  0xc5   :  { %1386 = vmatprep.subr.bf16.mxu0 %v4779_v24  ;;  %1550 = vmatprep.subr.bf16.mxu1 %v4782_v25  ;;  %v4875_v24 = vld [vmem:[#allocation5 + $0x4c] ss:$16 sps:$4 sm:$0xff]   ;;  %v4870_v25 = vld [vmem:[#allocation5 + $0x40] ss:$16 sps:$4 sm:$0xff]  }
  0xc8   :  { %1387 = vmatpush1.bf16.msra.mxu0 %v4777_v26  ;;  %1551 = vmatpush1.bf16.msra.mxu1 %v4780_v27  ;;  %v4873_v26 = vld [vmem:[#allocation5 + $0x48] ss:$16 sps:$4 sm:$0xff]   ;;  %v4878_v27 = vld [vmem:[#allocation5 + $0x64] ss:$16 sps:$4 sm:$0xff]  }
  0xc9   :  { %1388 = vmatprep.subr.bf16.mxu0 %v4785_v28  ;;  %1552 = vmatprep.subr.bf16.mxu1 %v4788_v29  ;;  %v4881_v28 = vld [vmem:[#allocation5 + $0x6c] ss:$16 sps:$4 sm:$0xff]   ;;  %v4876_v29 = vld [vmem:[#allocation5 + $0x60] ss:$16 sps:$4 sm:$0xff]  }
  0xcc   :  { %1389 = vmatpush1.bf16.msra.mxu0 %v4783_v30  ;;  %1553 = vmatpush1.bf16.msra.mxu1 %v4786_v31  ;;  %v4879_v30 = vld [vmem:[#allocation5 + $0x68] ss:$16 sps:$4 sm:$0xff]   ;;  %v4884_v31 = vld [vmem:[#allocation5 + $0x84] ss:$16 sps:$4 sm:$0xff]  }
  0xcd   :  { %1390 = vmatprep.subr.bf16.mxu0 %v4791_v32  ;;  %1554 = vmatprep.subr.bf16.mxu1 %v4794_v33  ;;  %v4887_v32 = vld [vmem:[#allocation5 + $0x8c] ss:$16 sps:$4 sm:$0xff]   ;;  %v4882_v33 = vld [vmem:[#allocation5 + $0x80] ss:$16 sps:$4 sm:$0xff]  }
  0xd0   :  { %1391 = vmatpush1.bf16.msra.mxu0 %v4789_v34  ;;  %1555 = vmatpush1.bf16.msra.mxu1 %v4792_v35  ;;  %v4885_v34 = vld [vmem:[#allocation5 + $0x88] ss:$16 sps:$4 sm:$0xff]   ;;  %v4890_v35 = vld [vmem:[#allocation5 + $0xa4] ss:$16 sps:$4 sm:$0xff]  }
  0xd1   :  { %1392 = vmatprep.subr.bf16.mxu0 %v4797_v36  ;;  %1556 = vmatprep.subr.bf16.mxu1 %v4800_v37  ;;  %v4893_v36 = vld [vmem:[#allocation5 + $0xac] ss:$16 sps:$4 sm:$0xff]   ;;  %v4888_v37 = vld [vmem:[#allocation5 + $0xa0] ss:$16 sps:$4 sm:$0xff]  }
  0xd4   :  { %1393 = vmatpush1.bf16.msra.mxu0 %v4795_v38  ;;  %1557 = vmatpush1.bf16.msra.mxu1 %v4798_v39  ;;  %v4891_v38 = vld [vmem:[#allocation5 + $0xa8] ss:$16 sps:$4 sm:$0xff]   ;;  %v4896_v39 = vld [vmem:[#allocation5 + $0xc4] ss:$16 sps:$4 sm:$0xff]  }
  0xd5   :  { %1394 = vmatprep.subr.bf16.mxu0 %v4803_v40  ;;  %1558 = vmatprep.subr.bf16.mxu1 %v4806_v41  ;;  %v4899_v40 = vld [vmem:[#allocation5 + $0xcc] ss:$16 sps:$4 sm:$0xff]   ;;  %v4894_v41 = vld [vmem:[#allocation5 + $0xc0] ss:$16 sps:$4 sm:$0xff]  }
  0xd8   :  { %1395 = vmatpush1.bf16.msra.mxu0 %v4801_v42  ;;  %1559 = vmatpush1.bf16.msra.mxu1 %v4804_v43  ;;  %v4897_v42 = vld [vmem:[#allocation5 + $0xc8] ss:$16 sps:$4 sm:$0xff]   ;;  %v4902_v43 = vld [vmem:[#allocation5 + $0xe4] ss:$16 sps:$4 sm:$0xff]  }
  0xd9   :  { %1396 = vmatprep.subr.bf16.mxu0 %v4809_v44  ;;  %1560 = vmatprep.subr.bf16.mxu1 %v4812_v45  ;;  %v4905_v44 = vld [vmem:[#allocation5 + $0xec] ss:$16 sps:$4 sm:$0xff]   ;;  %v4900_v45 = vld [vmem:[#allocation5 + $0xe0] ss:$16 sps:$4 sm:$0xff]  }
  0xdc   :  { %1397 = vmatpush1.bf16.msra.mxu0 %v4807_v46  ;;  %1561 = vmatpush1.bf16.msra.mxu1 %v4810_v47  ;;  %v4903_v46 = vld [vmem:[#allocation5 + $0xe8] ss:$16 sps:$4 sm:$0xff]   ;;  %v4908_v47 = vld [vmem:[#allocation5 + $0x104] ss:$16 sps:$4 sm:$0xff]  }
  0xdd   :  { %1398 = vmatprep.subr.bf16.mxu0 %v4815_v48  ;;  %1562 = vmatprep.subr.bf16.mxu1 %v4818_v49  ;;  %v4911_v48 = vld [vmem:[#allocation5 + $0x10c] ss:$16 sps:$4 sm:$0xff]   ;;  %v4906_v49 = vld [vmem:[#allocation5 + $0x100] ss:$16 sps:$4 sm:$0xff]  }
  0xe0   :  { %1399 = vmatpush1.bf16.msra.mxu0 %v4813_v50  ;;  %1563 = vmatpush1.bf16.msra.mxu1 %v4816_v51  ;;  %v4909_v50 = vld [vmem:[#allocation5 + $0x108] ss:$16 sps:$4 sm:$0xff]   ;;  %v4914_v51 = vld [vmem:[#allocation5 + $0x124] ss:$16 sps:$4 sm:$0xff]  }
  0xe1   :  { %1400 = vmatprep.subr.bf16.mxu0 %v4821_v52  ;;  %1564 = vmatprep.subr.bf16.mxu1 %v4824_v53  ;;  %v4917_v52 = vld [vmem:[#allocation5 + $0x12c] ss:$16 sps:$4 sm:$0xff]   ;;  %v4912_v53 = vld [vmem:[#allocation5 + $0x120] ss:$16 sps:$4 sm:$0xff]  }
  0xe4   :  { %1401 = vmatpush1.bf16.msra.mxu0 %v4819_v54  ;;  %1565 = vmatpush1.bf16.msra.mxu1 %v4822_v55  ;;  %v4915_v54 = vld [vmem:[#allocation5 + $0x128] ss:$16 sps:$4 sm:$0xff]   ;;  %v4920_v55 = vld [vmem:[#allocation5 + $0x144] ss:$16 sps:$4 sm:$0xff]  }
  0xe5   :  { %1402 = vmatprep.subr.bf16.mxu0 %v4827_v56  ;;  %1566 = vmatprep.subr.bf16.mxu1 %v4830_v57  ;;  %v4923_v56 = vld [vmem:[#allocation5 + $0x14c] ss:$16 sps:$4 sm:$0xff]   ;;  %v4918_v57 = vld [vmem:[#allocation5 + $0x140] ss:$16 sps:$4 sm:$0xff]  }
  0xe8   :  { %1403 = vmatpush1.bf16.msra.mxu0 %v4825_v58  ;;  %1567 = vmatpush1.bf16.msra.mxu1 %v4828_v59  ;;  %v4921_v58 = vld [vmem:[#allocation5 + $0x148] ss:$16 sps:$4 sm:$0xff]   ;;  %v4926_v59 = vld [vmem:[#allocation5 + $0x164] ss:$16 sps:$4 sm:$0xff]  }
  0xe9   :  { %1404 = vmatprep.subr.bf16.mxu0 %v4833_v60  ;;  %1568 = vmatprep.subr.bf16.mxu1 %v4836_v61  ;;  %v4929_v60 = vld [vmem:[#allocation5 + $0x16c] ss:$16 sps:$4 sm:$0xff]   ;;  %v4924_v61 = vld [vmem:[#allocation5 + $0x160] ss:$16 sps:$4 sm:$0xff]  }
  0xec   :  { %1405 = vmatpush1.bf16.msra.mxu0 %v4831_v62  ;;  %1569 = vmatpush1.bf16.msra.mxu1 %v4834_v63  ;;  %v4927_v62 = vld [vmem:[#allocation5 + $0x168] ss:$16 sps:$4 sm:$0xff]   ;;  %v4932_v63 = vld [vmem:[#allocation5 + $0x184] ss:$16 sps:$4 sm:$0xff]  }
  0xed   :  { %1406 = vmatprep.subr.bf16.mxu0 %v4839_v0  ;;  %1570 = vmatprep.subr.bf16.mxu1 %v4842_v1  ;;  %v4935_v0 = vld [vmem:[#allocation5 + $0x18c] ss:$16 sps:$4 sm:$0xff]   ;;  %v4930_v1 = vld [vmem:[#allocation5 + $0x180] ss:$16 sps:$4 sm:$0xff]  }
  0xf0   :  { %1407 = vmatpush1.bf16.msra.mxu0 %v4837_v2  ;;  %1571 = vmatpush1.bf16.msra.mxu1 %v4840_v3  ;;  %v4933_v2 = vld [vmem:[#allocation5 + $0x188] ss:$16 sps:$4 sm:$0xff]   ;;  %v4938_v3 = vld [vmem:[#allocation5 + $0x1a4] ss:$16 sps:$4 sm:$0xff]  }
  0xf1   :  { %1408 = vmatprep.subr.bf16.mxu0 %v4845_v4  ;;  %1572 = vmatprep.subr.bf16.mxu1 %v4848_v5  ;;  %v4941_v4 = vld [vmem:[#allocation5 + $0x1ac] ss:$16 sps:$4 sm:$0xff]   ;;  %v4936_v5 = vld [vmem:[#allocation5 + $0x1a0] ss:$16 sps:$4 sm:$0xff]  }
  0xf4   :  { %1409 = vmatpush1.bf16.msra.mxu0 %v4843_v6  ;;  %1573 = vmatpush1.bf16.msra.mxu1 %v4846_v7  ;;  %v4939_v6 = vld [vmem:[#allocation5 + $0x1a8] ss:$16 sps:$4 sm:$0xff]   ;;  %v4944_v7 = vld [vmem:[#allocation5 + $0x1c4] ss:$16 sps:$4 sm:$0xff]  }
  0xf5   :  { %1419 = vmatprep.subr.bf16.mxu0 %v4853_v8  ;;  %1583 = vmatprep.subr.bf16.mxu1 %v4856_v9  ;;  %v4947_v8 = vld [vmem:[#allocation5 + $0x1cc] ss:$16 sps:$4 sm:$0xff]   ;;  %v4942_v9 = vld [vmem:[#allocation5 + $0x1c0] ss:$16 sps:$4 sm:$0xff]  }
  0xf7   :  { %1411 = vmatmul.mubr.bf16.vlgmr.msra.gmra.mrb[0].mxu0 %v3954_v13  ;;  %1575 = vmatmul.mubr.bf16.vlgmr.msra.gmra.mrb[0].mxu1 %v3954_v13  ;;  %v4953_v13 = vld [vmem:[#allocation5 + $0x1ec] ss:$16 sps:$4 sm:$0xff]  }
  0xf8   :  { %1420 = vmatpush1.bf16.msra.mxu0 %v4851_v10  ;;  %1584 = vmatpush1.bf16.msra.mxu1 %v4854_v12  ;;  %v4945_v10 = vld [vmem:[#allocation5 + $0x1c8] ss:$16 sps:$4 sm:$0xff]   ;;  %v4950_v12 = vld [vmem:[#allocation5 + $0x1e4] ss:$16 sps:$4 sm:$0xff]  }
  0xf9   :  { %1451 = vmatprep.mubr.bf16.mxu0 %v5373_v16  ;;  %1615 = vmatprep.mubr.bf16.mxu1 %v5373_v16  ;;  %v4956_v16 = vld [vmem:[#allocation5 + $0x204] ss:$16 sps:$4 sm:$0xff]  }
  0xfa   :  { %2440 = vmatprep.subr.bf16.mxu0 %v4860_v14  ;;  %2522 = vmatprep.subr.bf16.mxu1 %v4863_v15  ;;  %v4948_v14 = vld [vmem:[#allocation5 + $0x1e0] ss:$16 sps:$4 sm:$0xff]   ;;  %v4951_v15 = vld [vmem:[#allocation5 + $0x1e8] ss:$16 sps:$4 sm:$0xff]  }
 0x103   :  { %4153 = vmatmul.mubr.msk.bf16.vlgmr.msra.gmra.mrb[0].mxu0 %vm1292_vm0, %v4857_v17  ;;  %4154 = vmatmul.mubr.msk.bf16.vlgmr.msra.gmra.mrb[0].mxu1 %vm1292_vm0, %v4857_v17  ;;  %v4959_v17 = vld [vmem:[#allocation5 + $0x20c] ss:$16 sps:$4 sm:$0xff]  }
 0x104   :  { %2441 = vmatpush1.bf16.msra.mxu0 %v4858_v11  ;;  %2523 = vmatpush1.bf16.msra.mxu1 %v4861_v18  ;;  %v268_v11 = vlaneseq }
 0x105   :  { %2442 = vmatprep.subr.bf16.mxu0 %v4866_v19  ;;  %2524 = vmatprep.subr.bf16.mxu1 %v4869_v20  ;;  %v5494_v20 = vld [vmem:[%s5655_s5] ss:$4 sm:$0xf] }
 0x106   :  { %v5486_v18 = vshrl.u32 %v268_v11, 7  ;;  %v4998_v11 = vld [vmem:[#allocation5 + $0x2e4] ss:$16 sps:$4 sm:$0xff]  }
 0x108   :  { %2443 = vmatpush1.bf16.msra.mxu0 %v4864_v21  ;;  %2525 = vmatpush1.bf16.msra.mxu1 %v4867_v22  ;;  %v5489_v19 = vsub.s32 0, %v5486_v18  ;;  %v5497_v21 = vsub.s32 1, %v5486_v18  ;;  %v5500_v22 = vsub.s32 3, %v5486_v18 }
 0x109   :  { %2444 = vmatprep.subr.bf16.mxu0 %v4872_v23  ;;  %2526 = vmatprep.subr.bf16.mxu1 %v4875_v24 }
 0x10a   :  { %v271_v23 = vrot.slane %v5494_v20, %v5489_v19  ;;  %v275_v24 = vrot.slane %v5494_v20, %v5497_v21 }
 0x10c   :  { %2445 = vmatpush1.bf16.msra.mxu0 %v4870_v25  ;;  %2527 = vmatpush1.bf16.msra.mxu1 %v4873_v26  ;;  %v283_v25 = vrot.slane %v5494_v20, %v5500_v22 }
 0x10d   :  { %2446 = vmatprep.subr.bf16.mxu0 %v4878_v27  ;;  %2528 = vmatprep.subr.bf16.mxu1 %v4881_v28 }
 0x110   :  { %2447 = vmatpush1.bf16.msra.mxu0 %v4876_v29  ;;  %2529 = vmatpush1.bf16.msra.mxu1 %v4879_v30 }
 0x111   :  { %2448 = vmatprep.subr.bf16.mxu0 %v4884_v31  ;;  %2530 = vmatprep.subr.bf16.mxu1 %v4887_v32 }
 0x114   :  { %2449 = vmatpush1.bf16.msra.mxu0 %v4882_v33  ;;  %2531 = vmatpush1.bf16.msra.mxu1 %v4885_v34 }
 0x115   :  { %2450 = vmatprep.subr.bf16.mxu0 %v4890_v35  ;;  %2532 = vmatprep.subr.bf16.mxu1 %v4893_v36 }
 0x118   :  { %2451 = vmatpush1.bf16.msra.mxu0 %v4888_v37  ;;  %2533 = vmatpush1.bf16.msra.mxu1 %v4891_v38 }
 0x119   :  { %2452 = vmatprep.subr.bf16.mxu0 %v4896_v39  ;;  %2534 = vmatprep.subr.bf16.mxu1 %v4899_v40 }
 0x11c   :  { %2453 = vmatpush1.bf16.msra.mxu0 %v4894_v41  ;;  %2535 = vmatpush1.bf16.msra.mxu1 %v4897_v42 }
 0x11d   :  { %2454 = vmatprep.subr.bf16.mxu0 %v4902_v43  ;;  %2536 = vmatprep.subr.bf16.mxu1 %v4905_v44 }
 0x120   :  { %2455 = vmatpush1.bf16.msra.mxu0 %v4900_v45  ;;  %2537 = vmatpush1.bf16.msra.mxu1 %v4903_v46 }
 0x121   :  { %2456 = vmatprep.subr.bf16.mxu0 %v4908_v47  ;;  %2538 = vmatprep.subr.bf16.mxu1 %v4911_v48 }
 0x124   :  { %2457 = vmatpush1.bf16.msra.mxu0 %v4906_v49  ;;  %2539 = vmatpush1.bf16.msra.mxu1 %v4909_v50 }
 0x125   :  { %2458 = vmatprep.subr.bf16.mxu0 %v4914_v51  ;;  %2540 = vmatprep.subr.bf16.mxu1 %v4917_v52 }
 0x128   :  { %2459 = vmatpush1.bf16.msra.mxu0 %v4912_v53  ;;  %2541 = vmatpush1.bf16.msra.mxu1 %v4915_v54  ;;  %v4954_v53 = vld [vmem:[#allocation5 + $0x200] ss:$16 sps:$4 sm:$0xff]   ;;  %v4957_v54 = vld [vmem:[#allocation5 + $0x208] ss:$16 sps:$4 sm:$0xff]  }
 0x129   :  { %2460 = vmatprep.subr.bf16.mxu0 %v4920_v55  ;;  %2542 = vmatprep.subr.bf16.mxu1 %v4923_v56  ;;  %v4962_v56 = vld [vmem:[#allocation5 + $0x224] ss:$16 sps:$4 sm:$0xff]  }
 0x12c   :  { %2461 = vmatpush1.bf16.msra.mxu0 %v4918_v57  ;;  %2543 = vmatpush1.bf16.msra.mxu1 %v4921_v58  ;;  %v4965_v57 = vld [vmem:[#allocation5 + $0x22c] ss:$16 sps:$4 sm:$0xff]  }
 0x12d   :  { %2462 = vmatprep.subr.bf16.mxu0 %v4926_v59  ;;  %2544 = vmatprep.subr.bf16.mxu1 %v4929_v60  ;;  %v4960_v59 = vld [vmem:[#allocation5 + $0x220] ss:$16 sps:$4 sm:$0xff]   ;;  %v4963_v60 = vld [vmem:[#allocation5 + $0x228] ss:$16 sps:$4 sm:$0xff]  }
 0x130   :  { %2463 = vmatpush1.bf16.msra.mxu0 %v4924_v61  ;;  %2545 = vmatpush1.bf16.msra.mxu1 %v4927_v62  ;;  %v4968_v61 = vld [vmem:[#allocation5 + $0x244] ss:$16 sps:$4 sm:$0xff]   ;;  %v4971_v62 = vld [vmem:[#allocation5 + $0x24c] ss:$16 sps:$4 sm:$0xff]  }
 0x131   :  { %2464 = vmatprep.subr.bf16.mxu0 %v4932_v63  ;;  %2546 = vmatprep.subr.bf16.mxu1 %v4935_v0  ;;  %v4966_v63 = vld [vmem:[#allocation5 + $0x240] ss:$16 sps:$4 sm:$0xff]   ;;  %v4969_v0 = vld [vmem:[#allocation5 + $0x248] ss:$16 sps:$4 sm:$0xff]  }
 0x134   :  { %2465 = vmatpush1.bf16.msra.mxu0 %v4930_v1  ;;  %2547 = vmatpush1.bf16.msra.mxu1 %v4933_v2  ;;  %v4974_v1 = vld [vmem:[#allocation5 + $0x264] ss:$16 sps:$4 sm:$0xff]   ;;  %v4977_v2 = vld [vmem:[#allocation5 + $0x26c] ss:$16 sps:$4 sm:$0xff]  }
 0x135   :  { %2466 = vmatprep.subr.bf16.mxu0 %v4938_v3  ;;  %2548 = vmatprep.subr.bf16.mxu1 %v4941_v4  ;;  %v4972_v3 = vld [vmem:[#allocation5 + $0x260] ss:$16 sps:$4 sm:$0xff]   ;;  %v4975_v4 = vld [vmem:[#allocation5 + $0x268] ss:$16 sps:$4 sm:$0xff]  }
 0x138   :  { %2467 = vmatpush1.bf16.msra.mxu0 %v4936_v5  ;;  %2549 = vmatpush1.bf16.msra.mxu1 %v4939_v6  ;;  %v4980_v5 = vld [vmem:[#allocation5 + $0x284] ss:$16 sps:$4 sm:$0xff]   ;;  %v4983_v6 = vld [vmem:[#allocation5 + $0x28c] ss:$16 sps:$4 sm:$0xff]  }
 0x139   :  { %2468 = vmatprep.subr.bf16.mxu0 %v4944_v7  ;;  %2550 = vmatprep.subr.bf16.mxu1 %v4947_v8  ;;  %v4978_v7 = vld [vmem:[#allocation5 + $0x280] ss:$16 sps:$4 sm:$0xff]   ;;  %v4981_v8 = vld [vmem:[#allocation5 + $0x288] ss:$16 sps:$4 sm:$0xff]  }
 0x13c   :  { %2469 = vmatpush1.bf16.msra.mxu0 %v4942_v9  ;;  %2551 = vmatpush1.bf16.msra.mxu1 %v4945_v10  ;;  %v4986_v9 = vld [vmem:[#allocation5 + $0x2a4] ss:$16 sps:$4 sm:$0xff]   ;;  %v4989_v10 = vld [vmem:[#allocation5 + $0x2ac] ss:$16 sps:$4 sm:$0xff]  }
 0x13d   :  { %2470 = vmatprep.subr.bf16.mxu0 %v4950_v12  ;;  %2552 = vmatprep.subr.bf16.mxu1 %v4953_v13  ;;  %v4984_v12 = vld [vmem:[#allocation5 + $0x2a0] ss:$16 sps:$4 sm:$0xff]   ;;  %v4987_v13 = vld [vmem:[#allocation5 + $0x2a8] ss:$16 sps:$4 sm:$0xff]  }
 0x140   :  { %2471 = vmatpush1.bf16.msra.mxu0 %v4948_v14  ;;  %2553 = vmatpush1.bf16.msra.mxu1 %v4951_v15  ;;  %v4992_v14 = vld [vmem:[#allocation5 + $0x2c4] ss:$16 sps:$4 sm:$0xff]   ;;  %v4995_v15 = vld [vmem:[#allocation5 + $0x2cc] ss:$16 sps:$4 sm:$0xff]  }
 0x141   :  { %2481 = vmatprep.subr.bf16.mxu0 %v4956_v16  ;;  %2563 = vmatprep.subr.bf16.mxu1 %v4959_v17  ;;  %v4990_v16 = vld [vmem:[#allocation5 + $0x2c0] ss:$16 sps:$4 sm:$0xff]   ;;  %v4993_v17 = vld [vmem:[#allocation5 + $0x2c8] ss:$16 sps:$4 sm:$0xff]  }
 0x1d6   :  { %v1453_v26 = vpop.f32.mrb[0].mxu0  ;;  %v5508_v27 = vpop.f32.mrb[0].mxu1 }
 0x1d7   :  { %v4490_v28 = vadd.f32 %v1453_v26, %v271_v23  ;;  %v1455_v29 = vpop.f32.mrb[1].mxu0  ;;  %v1619_v30 = vpop.f32.mrb[1].mxu1  ;;  %v5001_v23 = vld [vmem:[#allocation5 + $0x2ec] ss:$16 sps:$4 sm:$0xff]   ;;  %v5004_v26 = vld [vmem:[#allocation5 + $0x304] ss:$16 sps:$4 sm:$0xff]  }
 0x1d8   :  { %v4491_v31 = vadd.f32 %v1455_v29, %v275_v24  ;;  %v4493_v32 = vadd.f32 %v1619_v30, %v283_v25  ;;  %v1457_v33 = vpop.f32.mrb[2].mxu0  ;;  %v1621_v34 = vpop.f32.mrb[2].mxu1  ;;  %v4996_v24 = vld [vmem:[#allocation5 + $0x2e0] ss:$16 sps:$4 sm:$0xff]   ;;  %v4999_v25 = vld [vmem:[#allocation5 + $0x2e8] ss:$16 sps:$4 sm:$0xff]  }
 0x1d9   :  { %v1624_v35 = vmax.f32 %v4490_v28, 0.0  ;;  %v1458_v36 = vpop.f32.mrb[3].mxu0  ;;  %v1622_v37 = vpop.f32.mrb[3].mxu1  ;;  %v5007_v28 = vld [vmem:[#allocation5 + $0x30c] ss:$16 sps:$4 sm:$0xff]  }
 0x1da   :  { %v1625_v38 = vmax.f32 %v4491_v31, 0.0  ;;  %v1627_v39 = vmax.f32 %v4493_v32, 0.0  ;;  %v5002_v29 = vld [vmem:[#allocation5 + $0x300] ss:$16 sps:$4 sm:$0xff]   ;;  %v5005_v30 = vld [vmem:[#allocation5 + $0x308] ss:$16 sps:$4 sm:$0xff]  }
 0x1db   :  { %v1628_v40 = vmin.f32 %v1624_v35, 1.0  ;;  %v5511_v31 = vsub.s32 2, %v5486_v18  ;;  %v5010_v32 = vld [vmem:[#allocation5 + $0x324] ss:$16 sps:$4 sm:$0xff]   ;;  %v5013_v33 = vld [vmem:[#allocation5 + $0x32c] ss:$16 sps:$4 sm:$0xff]  }
 0x1dc   :  { %v1629_v41 = vmin.f32 %v1625_v38, 1.0  ;;  %v1631_v42 = vmin.f32 %v1627_v39, 1.0  ;;  %v5008_v34 = vld [vmem:[#allocation5 + $0x320] ss:$16 sps:$4 sm:$0xff]   ;;  %v5011_v35 = vld [vmem:[#allocation5 + $0x328] ss:$16 sps:$4 sm:$0xff]  }
 0x1dd   :  { %v1632_v43 = vmul.f32 15.0, %v1628_v40  ;;  %v279_v36 = vrot.slane %v5494_v20, %v5511_v31  ;;  %v5016_v37 = vld [vmem:[#allocation5 + $0x344] ss:$16 sps:$4 sm:$0xff]   ;;  %v5019_v38 = vld [vmem:[#allocation5 + $0x34c] ss:$16 sps:$4 sm:$0xff]  }
 0x1de   :  { %v1633_v44 = vmul.f32 15.0, %v1629_v41  ;;  %v1635_v45 = vmul.f32 15.0, %v1631_v42  ;;  %v5014_v39 = vld [vmem:[#allocation5 + $0x340] ss:$16 sps:$4 sm:$0xff]   ;;  %v5017_v18 = vld [vmem:[#allocation5 + $0x348] ss:$16 sps:$4 sm:$0xff]  }
 0x1df   :  { %v4542_v46 = vround.rtne.f32 %v1632_v43  ;;  %v4492_v40 = vadd.f32 %v5508_v27, %v279_v36  ;;  %v5022_v41 = vld [vmem:[#allocation5 + $0x364] ss:$16 sps:$4 sm:$0xff]   ;;  %v5025_v42 = vld [vmem:[#allocation5 + $0x36c] ss:$16 sps:$4 sm:$0xff]   ;;  %v5020_v43 = vld [vmem:[#allocation5 + $0x360] ss:$16 sps:$4 sm:$0xff]  }
 0x1e0   :  { %v4543_v47 = vround.rtne.f32 %v1633_v44  ;;  %v4545_v48 = vround.rtne.f32 %v1635_v45  ;;  %v5023_v44 = vld [vmem:[#allocation5 + $0x368] ss:$16 sps:$4 sm:$0xff]   ;;  %v5028_v20 = vld [vmem:[#allocation5 + $0x384] ss:$16 sps:$4 sm:$0xff]  }
 0x1e1   :  { %v1641_v49 = vmul.f32 0.06666667, %v4542_v46  ;;  %v1626_v45 = vmax.f32 %v4492_v40, 0.0  ;;  %v5031_v46 = vld [vmem:[#allocation5 + $0x38c] ss:$16 sps:$4 sm:$0xff]  }
 0x1e2   :  { %v1642_v50 = vmul.f32 0.06666667, %v4543_v47  ;;  %v1644_v51 = vmul.f32 0.06666667, %v4545_v48  ;;  %v5026_v47 = vld [vmem:[#allocation5 + $0x380] ss:$16 sps:$4 sm:$0xff]  }
 0x1e3   :  { %v1645_v55 = vpack.c.bf16 %v1641_v49, %v1641_v49  ;;  %v5029_v48 = vld [vmem:[#allocation5 + $0x388] ss:$16 sps:$4 sm:$0xff]   ;;  %v1630_v49 = vmin.f32 %v1626_v45, 1.0  ;;  %v5034_v27 = vld [vmem:[#allocation5 + $0x3a4] ss:$16 sps:$4 sm:$0xff]  }
 0x1e4   :  { %v1646_v52 = vpack.c.bf16 %v1642_v50, %v1642_v50  ;;  %v1648_v58 = vpack.c.bf16 %v1644_v51, %v1644_v51  ;;  %v5037_v50 = vld [vmem:[#allocation5 + $0x3ac] ss:$16 sps:$4 sm:$0xff]   ;;  %v5032_v51 = vld [vmem:[#allocation5 + $0x3a0] ss:$16 sps:$4 sm:$0xff]   ;;  %v5094_v36 = vld [vmem:[#allocation7 + $0xe4] ss:$16 sps:$4 sm:$0xff]  }
 0x1e5   :  { %v5103_v40 = vld [vmem:[#allocation7 + $0x10c] ss:$16 sps:$4 sm:$0xff]   ;;  %v5104_v45 = vld [vmem:[#allocation7 + $0x120] ss:$16 sps:$4 sm:$0xff]  }
 0x1e6   :  { %2472 = vmatprep.mubr.bf16.mxu0 %v1646_v52  ;;  %2554 = vmatprep.mubr.bf16.mxu1 %v1646_v52  ;;  %v5035_v52 = vld [vmem:[#allocation5 + $0x3a8] ss:$16 sps:$4 sm:$0xff]  }
 0x1e7   :  { %2473 = vmatmul.mubr.bf16.vlgmr.msra.gmra.mrb[4].mxu0 %v1645_v55  ;;  %2555 = vmatmul.mubr.bf16.vlgmr.msra.gmra.mrb[4].mxu1 %v1645_v55  ;;  %v5043_v55 = vld [vmem:[#allocation5 + $0x3cc] ss:$16 sps:$4 sm:$0xff]  }
 0x1e8   :  { %2482 = vmatpush1.bf16.msra.mxu0 %v4954_v53  ;;  %2564 = vmatpush1.bf16.msra.mxu1 %v4957_v54  ;;  %v1634_v53 = vmul.f32 15.0, %v1630_v49  ;;  %v5040_v54 = vld [vmem:[#allocation5 + $0x3c4] ss:$16 sps:$4 sm:$0xff]   ;;  %v5113_v49 = vld [vmem:[#allocation7 + $0x148] ss:$16 sps:$4 sm:$0xff]  }
 0x1e9   :  { %2513 = vmatprep.mubr.bf16.mxu0 %v1648_v58  ;;  %2595 = vmatprep.mubr.bf16.mxu1 %v1648_v58 }
 0x1ea   :  { %2483 = vmatprep.subr.bf16.mxu0 %v4962_v56  ;;  %2565 = vmatprep.subr.bf16.mxu1 %v4965_v57  ;;  %v5038_v56 = vld [vmem:[#allocation5 + $0x3c0] ss:$16 sps:$4 sm:$0xff]   ;;  %v5041_v57 = vld [vmem:[#allocation5 + $0x3c8] ss:$16 sps:$4 sm:$0xff]   ;;  %v4544_v58 = vround.rtne.f32 %v1634_v53  ;;  %v5124_v53 = vld [vmem:[#allocation7 + $0x184] ss:$16 sps:$4 sm:$0xff]  }
 0x1ec   :  { %2484 = vmatpush1.bf16.msra.mxu0 %v4960_v59  ;;  %2566 = vmatpush1.bf16.msra.mxu1 %v4963_v60  ;;  %v5046_v59 = vld [vmem:[#allocation5 + $0x3e4] ss:$16 sps:$4 sm:$0xff]   ;;  %v5049_v60 = vld [vmem:[#allocation5 + $0x3ec] ss:$16 sps:$4 sm:$0xff]  }
 0x1ed   :  { %2485 = vmatprep.subr.bf16.mxu0 %v4968_v61  ;;  %2567 = vmatprep.subr.bf16.mxu1 %v4971_v62  ;;  %v5044_v61 = vld [vmem:[#allocation5 + $0x3e0] ss:$16 sps:$4 sm:$0xff]   ;;  %v5047_v62 = vld [vmem:[#allocation5 + $0x3e8] ss:$16 sps:$4 sm:$0xff]  }
 0x1f0   :  { %2486 = vmatpush1.bf16.msra.mxu0 %v4966_v63  ;;  %2568 = vmatpush1.bf16.msra.mxu1 %v4969_v0  ;;  %v1643_v63 = vmul.f32 0.06666667, %v4544_v58  ;;  %v5052_v0 = vld [vmem:[#allocation7 + $0x4] ss:$16 sps:$4 sm:$0xff]   ;;  %v5133_v58 = vld [vmem:[#allocation7 + $0x1ac] ss:$16 sps:$4 sm:$0xff]  }
 0x1f1   :  { %2487 = vmatprep.subr.bf16.mxu0 %v4974_v1  ;;  %2569 = vmatprep.subr.bf16.mxu1 %v4977_v2  ;;  %v5055_v1 = vld [vmem:[#allocation7 + $0xc] ss:$16 sps:$4 sm:$0xff]   ;;  %v5050_v2 = vld [vmem:[#allocation7] ss:$16 sps:$4 sm:$0xff]  }
 0x1f4   :  { %2488 = vmatpush1.bf16.msra.mxu0 %v4972_v3  ;;  %2570 = vmatpush1.bf16.msra.mxu1 %v4975_v4  ;;  %v5053_v3 = vld [vmem:[#allocation7 + $0x8] ss:$16 sps:$4 sm:$0xff]   ;;  %v1647_v4 = vpack.c.bf16 %v1643_v63, %v1643_v63  ;;  %v5134_v63 = vld [vmem:[#allocation7 + $0x1c0] ss:$16 sps:$4 sm:$0xff]  }
 0x1f5   :  { %2489 = vmatprep.subr.bf16.mxu0 %v4980_v5  ;;  %2571 = vmatprep.subr.bf16.mxu1 %v4983_v6  ;;  %v5058_v5 = vld [vmem:[#allocation7 + $0x24] ss:$16 sps:$4 sm:$0xff]   ;;  %v5061_v6 = vld [vmem:[#allocation7 + $0x2c] ss:$16 sps:$4 sm:$0xff]  }
 0x1f8   :  { %2490 = vmatpush1.bf16.msra.mxu0 %v4978_v7  ;;  %2572 = vmatpush1.bf16.msra.mxu1 %v4981_v8  ;;  %v5056_v7 = vld [vmem:[#allocation7 + $0x20] ss:$16 sps:$4 sm:$0xff]   ;;  %v5059_v8 = vld [vmem:[#allocation7 + $0x28] ss:$16 sps:$4 sm:$0xff]  }
 0x1f9   :  { %2491 = vmatprep.subr.bf16.mxu0 %v4986_v9  ;;  %2573 = vmatprep.subr.bf16.mxu1 %v4989_v10  ;;  %v5064_v9 = vld [vmem:[#allocation7 + $0x44] ss:$16 sps:$4 sm:$0xff]   ;;  %v5067_v10 = vld [vmem:[#allocation7 + $0x4c] ss:$16 sps:$4 sm:$0xff]  }
 0x1fc   :  { %2492 = vmatpush1.bf16.msra.mxu0 %v4984_v12  ;;  %2574 = vmatpush1.bf16.msra.mxu1 %v4987_v13  ;;  %v5062_v12 = vld [vmem:[#allocation7 + $0x40] ss:$16 sps:$4 sm:$0xff]   ;;  %v5065_v13 = vld [vmem:[#allocation7 + $0x48] ss:$16 sps:$4 sm:$0xff]  }
 0x1fd   :  { %2493 = vmatprep.subr.bf16.mxu0 %v4992_v14  ;;  %2575 = vmatprep.subr.bf16.mxu1 %v4995_v15  ;;  %v5070_v14 = vld [vmem:[#allocation7 + $0x64] ss:$16 sps:$4 sm:$0xff]   ;;  %v5073_v15 = vld [vmem:[#allocation7 + $0x6c] ss:$16 sps:$4 sm:$0xff]  }
 0x200   :  { %2494 = vmatpush1.bf16.msra.mxu0 %v4990_v16  ;;  %2576 = vmatpush1.bf16.msra.mxu1 %v4993_v17  ;;  %v5068_v16 = vld [vmem:[#allocation7 + $0x60] ss:$16 sps:$4 sm:$0xff]   ;;  %v5071_v17 = vld [vmem:[#allocation7 + $0x68] ss:$16 sps:$4 sm:$0xff]  }
 0x201   :  { %2495 = vmatprep.subr.bf16.mxu0 %v4998_v11  ;;  %2577 = vmatprep.subr.bf16.mxu1 %v5001_v23  ;;  %v5076_v11 = vld [vmem:[#allocation7 + $0x84] ss:$16 sps:$4 sm:$0xff]   ;;  %v5079_v23 = vld [vmem:[#allocation7 + $0x8c] ss:$16 sps:$4 sm:$0xff]  }
 0x204   :  { %2496 = vmatpush1.bf16.msra.mxu0 %v4996_v24  ;;  %2578 = vmatpush1.bf16.msra.mxu1 %v4999_v25  ;;  %v5074_v24 = vld [vmem:[#allocation7 + $0x80] ss:$16 sps:$4 sm:$0xff]   ;;  %v5077_v25 = vld [vmem:[#allocation7 + $0x88] ss:$16 sps:$4 sm:$0xff]  }
 0x205   :  { %2497 = vmatprep.subr.bf16.mxu0 %v5004_v26  ;;  %2579 = vmatprep.subr.bf16.mxu1 %v5007_v28  ;;  %v5082_v26 = vld [vmem:[#allocation7 + $0xa4] ss:$16 sps:$4 sm:$0xff]   ;;  %v5085_v28 = vld [vmem:[#allocation7 + $0xac] ss:$16 sps:$4 sm:$0xff]  }
 0x208   :  { %2498 = vmatpush1.bf16.msra.mxu0 %v5002_v29  ;;  %2580 = vmatpush1.bf16.msra.mxu1 %v5005_v30  ;;  %v5080_v29 = vld [vmem:[#allocation7 + $0xa0] ss:$16 sps:$4 sm:$0xff]   ;;  %v5083_v30 = vld [vmem:[#allocation7 + $0xa8] ss:$16 sps:$4 sm:$0xff]  }
 0x209   :  { %2499 = vmatprep.subr.bf16.mxu0 %v5010_v32  ;;  %2581 = vmatprep.subr.bf16.mxu1 %v5013_v33  ;;  %v5088_v32 = vld [vmem:[#allocation7 + $0xc4] ss:$16 sps:$4 sm:$0xff]   ;;  %v5091_v33 = vld [vmem:[#allocation7 + $0xcc] ss:$16 sps:$4 sm:$0xff]  }
 0x20c   :  { %2500 = vmatpush1.bf16.msra.mxu0 %v5008_v34  ;;  %2582 = vmatpush1.bf16.msra.mxu1 %v5011_v35  ;;  %v5086_v34 = vld [vmem:[#allocation7 + $0xc0] ss:$16 sps:$4 sm:$0xff]   ;;  %v5089_v35 = vld [vmem:[#allocation7 + $0xc8] ss:$16 sps:$4 sm:$0xff]  }
 0x20d   :  { %2501 = vmatprep.subr.bf16.mxu0 %v5016_v37  ;;  %2583 = vmatprep.subr.bf16.mxu1 %v5019_v38  ;;  %v5097_v37 = vld [vmem:[#allocation7 + $0xec] ss:$16 sps:$4 sm:$0xff]   ;;  %v5092_v38 = vld [vmem:[#allocation7 + $0xe0] ss:$16 sps:$4 sm:$0xff]  }
 0x210   :  { %2502 = vmatpush1.bf16.msra.mxu0 %v5014_v39  ;;  %2584 = vmatpush1.bf16.msra.mxu1 %v5017_v18  ;;  %v5095_v39 = vld [vmem:[#allocation7 + $0xe8] ss:$16 sps:$4 sm:$0xff]   ;;  %v5100_v18 = vld [vmem:[#allocation7 + $0x104] ss:$16 sps:$4 sm:$0xff]  }
 0x211   :  { %2503 = vmatprep.subr.bf16.mxu0 %v5022_v41  ;;  %2585 = vmatprep.subr.bf16.mxu1 %v5025_v42  ;;  %v5098_v41 = vld [vmem:[#allocation7 + $0x100] ss:$16 sps:$4 sm:$0xff]   ;;  %v5101_v42 = vld [vmem:[#allocation7 + $0x108] ss:$16 sps:$4 sm:$0xff]  }
 0x214   :  { %2504 = vmatpush1.bf16.msra.mxu0 %v5020_v43  ;;  %2586 = vmatpush1.bf16.msra.mxu1 %v5023_v44  ;;  %v5106_v43 = vld [vmem:[#allocation7 + $0x124] ss:$16 sps:$4 sm:$0xff]   ;;  %v5109_v44 = vld [vmem:[#allocation7 + $0x12c] ss:$16 sps:$4 sm:$0xff]  }
 0x215   :  { %2505 = vmatprep.subr.bf16.mxu0 %v5028_v20  ;;  %2587 = vmatprep.subr.bf16.mxu1 %v5031_v46  ;;  %v5107_v20 = vld [vmem:[#allocation7 + $0x128] ss:$16 sps:$4 sm:$0xff]   ;;  %v5112_v46 = vld [vmem:[#allocation7 + $0x144] ss:$16 sps:$4 sm:$0xff]  }
 0x218   :  { %2506 = vmatpush1.bf16.msra.mxu0 %v5026_v47  ;;  %2588 = vmatpush1.bf16.msra.mxu1 %v5029_v48  ;;  %v5115_v47 = vld [vmem:[#allocation7 + $0x14c] ss:$16 sps:$4 sm:$0xff]   ;;  %v5110_v48 = vld [vmem:[#allocation7 + $0x140] ss:$16 sps:$4 sm:$0xff]  }
 0x219   :  { %2507 = vmatprep.subr.bf16.mxu0 %v5034_v27  ;;  %2589 = vmatprep.subr.bf16.mxu1 %v5037_v50  ;;  %v5118_v27 = vld [vmem:[#allocation7 + $0x164] ss:$16 sps:$4 sm:$0xff]   ;;  %v5121_v50 = vld [vmem:[#allocation7 + $0x16c] ss:$16 sps:$4 sm:$0xff]  }
 0x21c   :  { %2508 = vmatpush1.bf16.msra.mxu0 %v5032_v51  ;;  %2590 = vmatpush1.bf16.msra.mxu1 %v5035_v52  ;;  %v5116_v51 = vld [vmem:[#allocation7 + $0x160] ss:$16 sps:$4 sm:$0xff]   ;;  %v5119_v52 = vld [vmem:[#allocation7 + $0x168] ss:$16 sps:$4 sm:$0xff]  }
 0x21d   :  { %2509 = vmatprep.subr.bf16.mxu0 %v5040_v54  ;;  %2591 = vmatprep.subr.bf16.mxu1 %v5043_v55  ;;  %v5127_v54 = vld [vmem:[#allocation7 + $0x18c] ss:$16 sps:$4 sm:$0xff]   ;;  %v5122_v55 = vld [vmem:[#allocation7 + $0x180] ss:$16 sps:$4 sm:$0xff]  }
 0x220   :  { %2510 = vmatpush1.bf16.msra.mxu0 %v5038_v56  ;;  %2592 = vmatpush1.bf16.msra.mxu1 %v5041_v57  ;;  %v5125_v56 = vld [vmem:[#allocation7 + $0x188] ss:$16 sps:$4 sm:$0xff]   ;;  %v5130_v57 = vld [vmem:[#allocation7 + $0x1a4] ss:$16 sps:$4 sm:$0xff]  }
 0x221   :  { %2511 = vmatprep.subr.bf16.mxu0 %v5046_v59  ;;  %2593 = vmatprep.subr.bf16.mxu1 %v5049_v60  ;;  %v5128_v59 = vld [vmem:[#allocation7 + $0x1a0] ss:$16 sps:$4 sm:$0xff]   ;;  %v5131_v60 = vld [vmem:[#allocation7 + $0x1a8] ss:$16 sps:$4 sm:$0xff]  }
 0x224   :  { %2512 = vmatpush1.bf16.msra.mxu0 %v5044_v61  ;;  %2594 = vmatpush1.bf16.msra.mxu1 %v5047_v62  ;;  %v5136_v61 = vld [vmem:[#allocation7 + $0x1c4] ss:$16 sps:$4 sm:$0xff]   ;;  %v5139_v62 = vld [vmem:[#allocation7 + $0x1cc] ss:$16 sps:$4 sm:$0xff]  }
 0x225   :  { %3419 = vmatprep.subr.bf16.mxu0 %v5052_v0  ;;  %3501 = vmatprep.subr.bf16.mxu1 %v5055_v1  ;;  %v5137_v0 = vld [vmem:[#allocation7 + $0x1c8] ss:$16 sps:$4 sm:$0xff]   ;;  %v5142_v1 = vld [vmem:[#allocation7 + $0x1e4] ss:$16 sps:$4 sm:$0xff]  }
 0x227   :  { %2514 = vmatmul.mubr.bf16.vlgmr.msra.gmra.mrb[4].mxu0 %v1647_v4  ;;  %2596 = vmatmul.mubr.bf16.vlgmr.msra.gmra.mrb[4].mxu1 %v1647_v4  ;;  %v5143_v4 = vld [vmem:[#allocation7 + $0x1e8] ss:$16 sps:$4 sm:$0xff]  }
 0x228   :  { %3420 = vmatpush1.bf16.msra.mxu0 %v5050_v2  ;;  %3502 = vmatpush1.bf16.msra.mxu1 %v5053_v3  ;;  %v5145_v2 = vld [vmem:[#allocation7 + $0x1ec] ss:$16 sps:$4 sm:$0xff]   ;;  %v5140_v3 = vld [vmem:[#allocation7 + $0x1e0] ss:$16 sps:$4 sm:$0xff]  }
 0x229   :  { %3421 = vmatprep.subr.bf16.mxu0 %v5058_v5  ;;  %3503 = vmatprep.subr.bf16.mxu1 %v5061_v6  ;;  %v5148_v5 = vld [vmem:[#allocation7 + $0x204] ss:$16 sps:$4 sm:$0xff]   ;;  %v5151_v6 = vld [vmem:[#allocation7 + $0x20c] ss:$16 sps:$4 sm:$0xff]  }
 0x22c   :  { %3422 = vmatpush1.bf16.msra.mxu0 %v5056_v7  ;;  %3504 = vmatpush1.bf16.msra.mxu1 %v5059_v8  ;;  %v5519_v7 = vld [vmem:[%s5655_s5 + $0x1] ss:$4 sm:$0xf] }
 0x22d   :  { %3423 = vmatprep.subr.bf16.mxu0 %v5064_v9  ;;  %3505 = vmatprep.subr.bf16.mxu1 %v5067_v10  ;;  %v1783_v8 = vrot.slane %v5519_v7, %v5489_v19  ;;  %v1787_v9 = vrot.slane %v5519_v7, %v5497_v21  ;;  %v1795_v10 = vrot.slane %v5519_v7, %v5500_v22 }
 0x230   :  { %3424 = vmatpush1.bf16.msra.mxu0 %v5062_v12  ;;  %3506 = vmatpush1.bf16.msra.mxu1 %v5065_v13 }
 0x231   :  { %3425 = vmatprep.subr.bf16.mxu0 %v5070_v14  ;;  %3507 = vmatprep.subr.bf16.mxu1 %v5073_v15 }
 0x234   :  { %3426 = vmatpush1.bf16.msra.mxu0 %v5068_v16  ;;  %3508 = vmatpush1.bf16.msra.mxu1 %v5071_v17 }
 0x235   :  { %3427 = vmatprep.subr.bf16.mxu0 %v5076_v11  ;;  %3509 = vmatprep.subr.bf16.mxu1 %v5079_v23 }
 0x238   :  { %3428 = vmatpush1.bf16.msra.mxu0 %v5074_v24  ;;  %3510 = vmatpush1.bf16.msra.mxu1 %v5077_v25 }
 0x239   :  { %3429 = vmatprep.subr.bf16.mxu0 %v5082_v26  ;;  %3511 = vmatprep.subr.bf16.mxu1 %v5085_v28 }
 0x23c   :  { %3430 = vmatpush1.bf16.msra.mxu0 %v5080_v29  ;;  %3512 = vmatpush1.bf16.msra.mxu1 %v5083_v30 }
 0x23d   :  { %3431 = vmatprep.subr.bf16.mxu0 %v5088_v32  ;;  %3513 = vmatprep.subr.bf16.mxu1 %v5091_v33 }
 0x240   :  { %3432 = vmatpush1.bf16.msra.mxu0 %v5086_v34  ;;  %3514 = vmatpush1.bf16.msra.mxu1 %v5089_v35 }
 0x241   :  { %3433 = vmatprep.subr.bf16.mxu0 %v5094_v36  ;;  %3515 = vmatprep.subr.bf16.mxu1 %v5097_v37 }
 0x244   :  { %3434 = vmatpush1.bf16.msra.mxu0 %v5092_v38  ;;  %3516 = vmatpush1.bf16.msra.mxu1 %v5095_v39 }
 0x245   :  { %3435 = vmatprep.subr.bf16.mxu0 %v5100_v18  ;;  %3517 = vmatprep.subr.bf16.mxu1 %v5103_v40 }
 0x248   :  { %3436 = vmatpush1.bf16.msra.mxu0 %v5098_v41  ;;  %3518 = vmatpush1.bf16.msra.mxu1 %v5101_v42 }
 0x249   :  { %3437 = vmatprep.subr.bf16.mxu0 %v5106_v43  ;;  %3519 = vmatprep.subr.bf16.mxu1 %v5109_v44  ;;  %v5146_v44 = vld [vmem:[#allocation7 + $0x200] ss:$16 sps:$4 sm:$0xff]  }
 0x24c   :  { %3438 = vmatpush1.bf16.msra.mxu0 %v5104_v45  ;;  %3520 = vmatpush1.bf16.msra.mxu1 %v5107_v20  ;;  %v5149_v45 = vld [vmem:[#allocation7 + $0x208] ss:$16 sps:$4 sm:$0xff]  }
 0x24d   :  { %3439 = vmatprep.subr.bf16.mxu0 %v5112_v46  ;;  %3521 = vmatprep.subr.bf16.mxu1 %v5115_v47  ;;  %v5154_v46 = vld [vmem:[#allocation7 + $0x224] ss:$16 sps:$4 sm:$0xff]   ;;  %v5157_v47 = vld [vmem:[#allocation7 + $0x22c] ss:$16 sps:$4 sm:$0xff]  }
 0x250   :  { %3440 = vmatpush1.bf16.msra.mxu0 %v5110_v48  ;;  %3522 = vmatpush1.bf16.msra.mxu1 %v5113_v49  ;;  %v5152_v49 = vld [vmem:[#allocation7 + $0x220] ss:$16 sps:$4 sm:$0xff]  }
 0x251   :  { %3441 = vmatprep.subr.bf16.mxu0 %v5118_v27  ;;  %3523 = vmatprep.subr.bf16.mxu1 %v5121_v50  ;;  %v5155_v27 = vld [vmem:[#allocation7 + $0x228] ss:$16 sps:$4 sm:$0xff]   ;;  %v5160_v50 = vld [vmem:[#allocation7 + $0x244] ss:$16 sps:$4 sm:$0xff]  }
 0x254   :  { %3442 = vmatpush1.bf16.msra.mxu0 %v5116_v51  ;;  %3524 = vmatpush1.bf16.msra.mxu1 %v5119_v52  ;;  %v5163_v51 = vld [vmem:[#allocation7 + $0x24c] ss:$16 sps:$4 sm:$0xff]   ;;  %v5158_v52 = vld [vmem:[#allocation7 + $0x240] ss:$16 sps:$4 sm:$0xff]  }
 0x255   :  { %3443 = vmatprep.subr.bf16.mxu0 %v5124_v53  ;;  %3525 = vmatprep.subr.bf16.mxu1 %v5127_v54  ;;  %v5161_v53 = vld [vmem:[#allocation7 + $0x248] ss:$16 sps:$4 sm:$0xff]   ;;  %v5166_v54 = vld [vmem:[#allocation7 + $0x264] ss:$16 sps:$4 sm:$0xff]  }
 0x258   :  { %3444 = vmatpush1.bf16.msra.mxu0 %v5122_v55  ;;  %3526 = vmatpush1.bf16.msra.mxu1 %v5125_v56  ;;  %v5169_v55 = vld [vmem:[#allocation7 + $0x26c] ss:$16 sps:$4 sm:$0xff]   ;;  %v5164_v56 = vld [vmem:[#allocation7 + $0x260] ss:$16 sps:$4 sm:$0xff]  }
 0x259   :  { %3445 = vmatprep.subr.bf16.mxu0 %v5130_v57  ;;  %3527 = vmatprep.subr.bf16.mxu1 %v5133_v58  ;;  %v5167_v57 = vld [vmem:[#allocation7 + $0x268] ss:$16 sps:$4 sm:$0xff]   ;;  %v5172_v58 = vld [vmem:[#allocation7 + $0x284] ss:$16 sps:$4 sm:$0xff]  }
 0x25c   :  { %3446 = vmatpush1.bf16.msra.mxu0 %v5128_v59  ;;  %3528 = vmatpush1.bf16.msra.mxu1 %v5131_v60  ;;  %v5175_v59 = vld [vmem:[#allocation7 + $0x28c] ss:$16 sps:$4 sm:$0xff]   ;;  %v5170_v60 = vld [vmem:[#allocation7 + $0x280] ss:$16 sps:$4 sm:$0xff]  }
 0x25d   :  { %3447 = vmatprep.subr.bf16.mxu0 %v5136_v61  ;;  %3529 = vmatprep.subr.bf16.mxu1 %v5139_v62  ;;  %v5173_v61 = vld [vmem:[#allocation7 + $0x288] ss:$16 sps:$4 sm:$0xff]   ;;  %v5178_v62 = vld [vmem:[#allocation7 + $0x2a4] ss:$16 sps:$4 sm:$0xff]  }
 0x260   :  { %3448 = vmatpush1.bf16.msra.mxu0 %v5134_v63  ;;  %3530 = vmatpush1.bf16.msra.mxu1 %v5137_v0  ;;  %v5181_v63 = vld [vmem:[#allocation7 + $0x2ac] ss:$16 sps:$4 sm:$0xff]   ;;  %v5176_v0 = vld [vmem:[#allocation7 + $0x2a0] ss:$16 sps:$4 sm:$0xff]  }
 0x261   :  { %3449 = vmatprep.subr.bf16.mxu0 %v5142_v1  ;;  %3531 = vmatprep.subr.bf16.mxu1 %v5145_v2  ;;  %v5179_v1 = vld [vmem:[#allocation7 + $0x2a8] ss:$16 sps:$4 sm:$0xff]   ;;  %v5184_v2 = vld [vmem:[#allocation7 + $0x2c4] ss:$16 sps:$4 sm:$0xff]  }
 0x264   :  { %3450 = vmatpush1.bf16.msra.mxu0 %v5140_v3  ;;  %3532 = vmatpush1.bf16.msra.mxu1 %v5143_v4  ;;  %v5187_v3 = vld [vmem:[#allocation7 + $0x2cc] ss:$16 sps:$4 sm:$0xff]   ;;  %v5182_v4 = vld [vmem:[#allocation7 + $0x2c0] ss:$16 sps:$4 sm:$0xff]  }
 0x265   :  { %3460 = vmatprep.subr.bf16.mxu0 %v5148_v5  ;;  %3542 = vmatprep.subr.bf16.mxu1 %v5151_v6  ;;  %v5185_v5 = vld [vmem:[#allocation7 + $0x2c8] ss:$16 sps:$4 sm:$0xff]   ;;  %v5190_v6 = vld [vmem:[#allocation7 + $0x2e4] ss:$16 sps:$4 sm:$0xff]  }
 0x2fa   :  { %v2515_v12 = vpop.f32.mrb[4].mxu0  ;;  %v5527_v13 = vpop.f32.mrb[4].mxu1 }
 0x2fb   :  { %v4494_v14 = vadd.f32 %v2515_v12, %v1783_v8  ;;  %v2517_v15 = vpop.f32.mrb[5].mxu0  ;;  %v2599_v16 = vpop.f32.mrb[5].mxu1  ;;  %v5193_v8 = vld [vmem:[#allocation7 + $0x2ec] ss:$16 sps:$4 sm:$0xff]   ;;  %v5196_v12 = vld [vmem:[#allocation7 + $0x304] ss:$16 sps:$4 sm:$0xff]  }
 0x2fc   :  { %v4495_v17 = vadd.f32 %v2517_v15, %v1787_v9  ;;  %v4497_v11 = vadd.f32 %v2599_v16, %v1795_v10  ;;  %v2519_v23 = vpop.f32.mrb[6].mxu0  ;;  %v2601_v24 = vpop.f32.mrb[6].mxu1  ;;  %v5188_v9 = vld [vmem:[#allocation7 + $0x2e0] ss:$16 sps:$4 sm:$0xff]   ;;  %v5191_v10 = vld [vmem:[#allocation7 + $0x2e8] ss:$16 sps:$4 sm:$0xff]  }
 0x2fd   :  { %v2604_v25 = vmax.f32 %v4494_v14, 0.0  ;;  %v2520_v26 = vpop.f32.mrb[7].mxu0  ;;  %v2602_v28 = vpop.f32.mrb[7].mxu1  ;;  %v5199_v14 = vld [vmem:[#allocation7 + $0x30c] ss:$16 sps:$4 sm:$0xff]  }
 0x2fe   :  { %v2605_v29 = vmax.f32 %v4495_v17, 0.0  ;;  %v2607_v30 = vmax.f32 %v4497_v11, 0.0  ;;  %v5194_v15 = vld [vmem:[#allocation7 + $0x300] ss:$16 sps:$4 sm:$0xff]   ;;  %v5197_v16 = vld [vmem:[#allocation7 + $0x308] ss:$16 sps:$4 sm:$0xff]  }
 0x2ff   :  { %v2608_v32 = vmin.f32 %v2604_v25, 1.0  ;;  %v5202_v17 = vld [vmem:[#allocation7 + $0x324] ss:$16 sps:$4 sm:$0xff]   ;;  %v5205_v11 = vld [vmem:[#allocation7 + $0x32c] ss:$16 sps:$4 sm:$0xff]   ;;  %v1791_v25 = vrot.slane %v5519_v7, %v5511_v31 }
 0x300   :  { %v2609_v33 = vmin.f32 %v2605_v29, 1.0  ;;  %v2611_v34 = vmin.f32 %v2607_v30, 1.0  ;;  %v5200_v23 = vld [vmem:[#allocation7 + $0x320] ss:$16 sps:$4 sm:$0xff]   ;;  %v5203_v24 = vld [vmem:[#allocation7 + $0x328] ss:$16 sps:$4 sm:$0xff]  }
 0x301   :  { %v2612_v35 = vmul.f32 15.0, %v2608_v32  ;;  %v5208_v26 = vld [vmem:[#allocation7 + $0x344] ss:$16 sps:$4 sm:$0xff]   ;;  %v5211_v28 = vld [vmem:[#allocation7 + $0x34c] ss:$16 sps:$4 sm:$0xff]   ;;  %v4496_v32 = vadd.f32 %v5527_v13, %v1791_v25 }
 0x302   :  { %v2613_v36 = vmul.f32 15.0, %v2609_v33  ;;  %v2615_v37 = vmul.f32 15.0, %v2611_v34  ;;  %v5206_v29 = vld [vmem:[#allocation7 + $0x340] ss:$16 sps:$4 sm:$0xff]   ;;  %v5209_v30 = vld [vmem:[#allocation7 + $0x348] ss:$16 sps:$4 sm:$0xff]  }
 0x303   :  { %v4546_v38 = vround.rtne.f32 %v2612_v35  ;;  %v5214_v33 = vld [vmem:[#allocation7 + $0x364] ss:$16 sps:$4 sm:$0xff]   ;;  %v5217_v34 = vld [vmem:[#allocation7 + $0x36c] ss:$16 sps:$4 sm:$0xff]   ;;  %v5212_v35 = vld [vmem:[#allocation7 + $0x360] ss:$16 sps:$4 sm:$0xff]  }
 0x304   :  { %v4547_v39 = vround.rtne.f32 %v2613_v36  ;;  %v4549_v18 = vround.rtne.f32 %v2615_v37  ;;  %v5215_v36 = vld [vmem:[#allocation7 + $0x368] ss:$16 sps:$4 sm:$0xff]   ;;  %v2606_v37 = vmax.f32 %v4496_v32, 0.0  ;;  %v5220_v7 = vld [vmem:[#allocation7 + $0x384] ss:$16 sps:$4 sm:$0xff]  }
 0x305   :  { %v2620_v40 = vmul.f32 0.06666667, %v4546_v38  ;;  %v5223_v38 = vld [vmem:[#allocation7 + $0x38c] ss:$16 sps:$4 sm:$0xff]   ;;  %v5226_v13 = vld [vmem:[#allocation7 + $0x3a4] ss:$16 sps:$4 sm:$0xff]  }
 0x306   :  { %v2621_v41 = vmul.f32 0.06666667, %v4547_v39  ;;  %v2623_v42 = vmul.f32 0.06666667, %v4549_v18  ;;  %v5218_v39 = vld [vmem:[#allocation7 + $0x380] ss:$16 sps:$4 sm:$0xff]  }
 0x307   :  { %v2624_v20 = vpack.c.bf16 %v2620_v40, %v2620_v40  ;;  %v5221_v18 = vld [vmem:[#allocation7 + $0x388] ss:$16 sps:$4 sm:$0xff]   ;;  %v2610_v40 = vmin.f32 %v2606_v37, 1.0 }
 0x308   :  { %v2625_v43 = vpack.c.bf16 %v2621_v41, %v2621_v41  ;;  %v2627_v48 = vpack.c.bf16 %v2623_v42, %v2623_v42  ;;  %v5229_v41 = vld [vmem:[#allocation7 + $0x3ac] ss:$16 sps:$4 sm:$0xff]   ;;  %v5224_v42 = vld [vmem:[#allocation7 + $0x3a0] ss:$16 sps:$4 sm:$0xff]  }
 0x309   :  { %v5270_v25 = vld [vmem:[%s5654_s4 + $0x78] sm:$0xff]  }
 0x30a   :  { %3451 = vmatprep.mubr.bf16.mxu0 %v2625_v43  ;;  %3533 = vmatprep.mubr.bf16.mxu1 %v2625_v43  ;;  %v5227_v43 = vld [vmem:[#allocation7 + $0x3a8] ss:$16 sps:$4 sm:$0xff]  }
 0x30b   :  { %3452 = vmatmul.mubr.bf16.vlgmr.msra.gmra.mrb[8].mxu0 %v2624_v20  ;;  %3534 = vmatmul.mubr.bf16.vlgmr.msra.gmra.mrb[8].mxu1 %v2624_v20  ;;  %v5235_v20 = vld [vmem:[#allocation7 + $0x3cc] ss:$16 sps:$4 sm:$0xff]  }
 0x30c   :  { %3461 = vmatpush1.bf16.msra.mxu0 %v5146_v44  ;;  %3543 = vmatpush1.bf16.msra.mxu1 %v5149_v45  ;;  %v2614_v44 = vmul.f32 15.0, %v2610_v40  ;;  %v5232_v45 = vld [vmem:[#allocation7 + $0x3c4] ss:$16 sps:$4 sm:$0xff]  }
 0x30d   :  { %3492 = vmatprep.mubr.bf16.mxu0 %v2627_v48  ;;  %3574 = vmatprep.mubr.bf16.mxu1 %v2627_v48 }
 0x30e   :  { %3462 = vmatprep.subr.bf16.mxu0 %v5154_v46  ;;  %3544 = vmatprep.subr.bf16.mxu1 %v5157_v47  ;;  %v5230_v46 = vld [vmem:[#allocation7 + $0x3c0] ss:$16 sps:$4 sm:$0xff]   ;;  %v5233_v47 = vld [vmem:[#allocation7 + $0x3c8] ss:$16 sps:$4 sm:$0xff]   ;;  %v4548_v48 = vround.rtne.f32 %v2614_v44 }
 0x310   :  { %3463 = vmatpush1.bf16.msra.mxu0 %v5152_v49  ;;  %3545 = vmatpush1.bf16.msra.mxu1 %v5155_v27  ;;  %v5238_v49 = vld [vmem:[#allocation7 + $0x3e4] ss:$16 sps:$4 sm:$0xff]   ;;  %v5241_v27 = vld [vmem:[#allocation7 + $0x3ec] ss:$16 sps:$4 sm:$0xff]  }
 0x311   :  { %3464 = vmatprep.subr.bf16.mxu0 %v5160_v50  ;;  %3546 = vmatprep.subr.bf16.mxu1 %v5163_v51  ;;  %v5236_v50 = vld [vmem:[#allocation7 + $0x3e0] ss:$16 sps:$4 sm:$0xff]   ;;  %v5239_v51 = vld [vmem:[#allocation7 + $0x3e8] ss:$16 sps:$4 sm:$0xff]  }
 0x314   :  { %3465 = vmatpush1.bf16.msra.mxu0 %v5158_v52  ;;  %3547 = vmatpush1.bf16.msra.mxu1 %v5161_v53  ;;  %v2622_v52 = vmul.f32 0.06666667, %v4548_v48  ;;  %v5242_v53 = vld [vmem:[%s5654_s4 + $0x40] sm:$0xff]  }
 0x315   :  { %3466 = vmatprep.subr.bf16.mxu0 %v5166_v54  ;;  %3548 = vmatprep.subr.bf16.mxu1 %v5169_v55  ;;  %v5243_v54 = vld [vmem:[%s5654_s4 + $0xc0] sm:$0xff]  }
 0x316   :  { %v5244_v55 = vld [vmem:[%s5654_s4] sm:$0xff]  }
 0x318   :  { %3467 = vmatpush1.bf16.msra.mxu0 %v5164_v56  ;;  %3549 = vmatpush1.bf16.msra.mxu1 %v5167_v57  ;;  %v5245_v56 = vld [vmem:[%s5654_s4 + $0x80] sm:$0xff]   ;;  %v2626_v57 = vpack.c.bf16 %v2622_v52, %v2622_v52 }
 0x319   :  { %3468 = vmatprep.subr.bf16.mxu0 %v5172_v58  ;;  %3550 = vmatprep.subr.bf16.mxu1 %v5175_v59  ;;  %v5246_v58 = vld [vmem:[%s5654_s4 + $0x48] sm:$0xff]  }
 0x31a   :  { %v5247_v59 = vld [vmem:[%s5654_s4 + $0xc8] sm:$0xff]  }
 0x31c   :  { %3469 = vmatpush1.bf16.msra.mxu0 %v5170_v60  ;;  %3551 = vmatpush1.bf16.msra.mxu1 %v5173_v61  ;;  %v5248_v60 = vld [vmem:[%s5654_s4 + $0x8] sm:$0xff]  }
 0x31d   :  { %3470 = vmatprep.subr.bf16.mxu0 %v5178_v62  ;;  %3552 = vmatprep.subr.bf16.mxu1 %v5181_v63  ;;  %v5249_v61 = vld [vmem:[%s5654_s4 + $0x88] sm:$0xff]   ;;  %v5250_v62 = vld [vmem:[%s5654_s4 + $0x50] sm:$0xff]  }
 0x31e   :  { %v5251_v63 = vld [vmem:[%s5654_s4 + $0xd0] sm:$0xff]  }
 0x320   :  { %3471 = vmatpush1.bf16.msra.mxu0 %v5176_v0  ;;  %3553 = vmatpush1.bf16.msra.mxu1 %v5179_v1  ;;  %v5252_v0 = vld [vmem:[%s5654_s4 + $0x10] sm:$0xff]  }
 0x321   :  { %3472 = vmatprep.subr.bf16.mxu0 %v5184_v2  ;;  %3554 = vmatprep.subr.bf16.mxu1 %v5187_v3  ;;  %v5253_v1 = vld [vmem:[%s5654_s4 + $0x90] sm:$0xff]   ;;  %v5254_v2 = vld [vmem:[%s5654_s4 + $0x58] sm:$0xff]  }
 0x322   :  { %v5255_v3 = vld [vmem:[%s5654_s4 + $0xd8] sm:$0xff]  }
 0x324   :  { %3473 = vmatpush1.bf16.msra.mxu0 %v5182_v4  ;;  %3555 = vmatpush1.bf16.msra.mxu1 %v5185_v5  ;;  %v5256_v4 = vld [vmem:[%s5654_s4 + $0x18] sm:$0xff]  }
 0x325   :  { %3474 = vmatprep.subr.bf16.mxu0 %v5190_v6  ;;  %3556 = vmatprep.subr.bf16.mxu1 %v5193_v8  ;;  %v5257_v5 = vld [vmem:[%s5654_s4 + $0x98] sm:$0xff]   ;;  %v5258_v6 = vld [vmem:[%s5654_s4 + $0x60] sm:$0xff]  }
 0x326   :  { %v5259_v8 = vld [vmem:[%s5654_s4 + $0xe0] sm:$0xff]  }
 0x328   :  { %3475 = vmatpush1.bf16.msra.mxu0 %v5188_v9  ;;  %3557 = vmatpush1.bf16.msra.mxu1 %v5191_v10  ;;  %v5260_v9 = vld [vmem:[%s5654_s4 + $0x20] sm:$0xff]  }
 0x329   :  { %3476 = vmatprep.subr.bf16.mxu0 %v5196_v12  ;;  %3558 = vmatprep.subr.bf16.mxu1 %v5199_v14  ;;  %v5261_v10 = vld [vmem:[%s5654_s4 + $0xa0] sm:$0xff]   ;;  %v5262_v12 = vld [vmem:[%s5654_s4 + $0x68] sm:$0xff]  }
 0x32a   :  { %v5263_v14 = vld [vmem:[%s5654_s4 + $0xe8] sm:$0xff]  }
 0x32c   :  { %3477 = vmatpush1.bf16.msra.mxu0 %v5194_v15  ;;  %3559 = vmatpush1.bf16.msra.mxu1 %v5197_v16  ;;  %v5264_v15 = vld [vmem:[%s5654_s4 + $0x28] sm:$0xff]  }
 0x32d   :  { %3478 = vmatprep.subr.bf16.mxu0 %v5202_v17  ;;  %3560 = vmatprep.subr.bf16.mxu1 %v5205_v11  ;;  %v5265_v16 = vld [vmem:[%s5654_s4 + $0xa8] sm:$0xff]   ;;  %v5266_v17 = vld [vmem:[%s5654_s4 + $0x70] sm:$0xff]  }
 0x32e   :  { %v5267_v11 = vld [vmem:[%s5654_s4 + $0xf0] sm:$0xff]  }
 0x330   :  { %3479 = vmatpush1.bf16.msra.mxu0 %v5200_v23  ;;  %3561 = vmatpush1.bf16.msra.mxu1 %v5203_v24  ;;  %v5268_v23 = vld [vmem:[%s5654_s4 + $0x30] sm:$0xff]  }
 0x331   :  { %3480 = vmatprep.subr.bf16.mxu0 %v5208_v26  ;;  %3562 = vmatprep.subr.bf16.mxu1 %v5211_v28  ;;  %v5269_v24 = vld [vmem:[%s5654_s4 + $0xb0] sm:$0xff]   ;;  %v5271_v26 = vld [vmem:[%s5654_s4 + $0xf8] sm:$0xff]  }
 0x332   :  { %v5272_v28 = vld [vmem:[%s5654_s4 + $0x38] sm:$0xff]  }
 0x334   :  { %3481 = vmatpush1.bf16.msra.mxu0 %v5206_v29  ;;  %3563 = vmatpush1.bf16.msra.mxu1 %v5209_v30  ;;  %v5273_v29 = vld [vmem:[%s5654_s4 + $0xb8] sm:$0xff]   ;;  %v4284_v30 = vld [vmem:[%s5655_s5 + $0x2] ss:$4 sm:$0xf] }
 0x335   :  { %3482 = vmatprep.subr.bf16.mxu0 %v5214_v33  ;;  %3564 = vmatprep.subr.bf16.mxu1 %v5217_v34  ;;  %v2762_v32 = vrot.slane %v4284_v30, %v5489_v19  ;;  %v2770_v33 = vrot.slane %v4284_v30, %v5511_v31  ;;  %v2766_v34 = vrot.slane %v4284_v30, %v5497_v21 }
 0x338   :  { %3483 = vmatpush1.bf16.msra.mxu0 %v5212_v35  ;;  %3565 = vmatpush1.bf16.msra.mxu1 %v5215_v36  ;;  %v2774_v35 = vrot.slane %v4284_v30, %v5500_v22 }
 0x339   :  { %3484 = vmatprep.subr.bf16.mxu0 %v5220_v7  ;;  %3566 = vmatprep.subr.bf16.mxu1 %v5223_v38 }
 0x33c   :  { %3485 = vmatpush1.bf16.msra.mxu0 %v5218_v39  ;;  %3567 = vmatpush1.bf16.msra.mxu1 %v5221_v18 }
 0x33d   :  { %3486 = vmatprep.subr.bf16.mxu0 %v5226_v13  ;;  %3568 = vmatprep.subr.bf16.mxu1 %v5229_v41 }
 0x340   :  { %3487 = vmatpush1.bf16.msra.mxu0 %v5224_v42  ;;  %3569 = vmatpush1.bf16.msra.mxu1 %v5227_v43 }
 0x341   :  { %3488 = vmatprep.subr.bf16.mxu0 %v5232_v45  ;;  %3570 = vmatprep.subr.bf16.mxu1 %v5235_v20 }
 0x344   :  { %3489 = vmatpush1.bf16.msra.mxu0 %v5230_v46  ;;  %3571 = vmatpush1.bf16.msra.mxu1 %v5233_v47 }
 0x345   :  { %3490 = vmatprep.subr.bf16.mxu0 %v5238_v49  ;;  %3572 = vmatprep.subr.bf16.mxu1 %v5241_v27  ;;  %v4413_v27 = vld [vmem:[%s5655_s5 + $0x3] ss:$0 sm:$0xff] }
 0x348   :  { %3491 = vmatpush1.bf16.msra.mxu0 %v5236_v50  ;;  %3573 = vmatpush1.bf16.msra.mxu1 %v5239_v51 }
 0x349   :  { %4446 = vmatprep.subr.bf16.mxu0 %v5242_v53  ;;  %4468 = vmatprep.subr.bf16.mxu1 %v5243_v54 }
 0x34b   :  { %3493 = vmatmul.mubr.bf16.vlgmr.msra.gmra.mrb[8].mxu0 %v2626_v57  ;;  %3575 = vmatmul.mubr.bf16.vlgmr.msra.gmra.mrb[8].mxu1 %v2626_v57 }
 0x34c   :  { %4447 = vmatpush3.bf16.msra.mxu0 %v5244_v55  ;;  %4469 = vmatpush3.bf16.msra.mxu1 %v5245_v56 }
 0x34d   :  { %4448 = vmatprep.subr.bf16.mxu0 %v5246_v58  ;;  %4470 = vmatprep.subr.bf16.mxu1 %v5247_v59 }
 0x350   :  { %4449 = vmatpush3.bf16.msra.mxu0 %v5248_v60  ;;  %4471 = vmatpush3.bf16.msra.mxu1 %v5249_v61 }
 0x351   :  { %4450 = vmatprep.subr.bf16.mxu0 %v5250_v62  ;;  %4472 = vmatprep.subr.bf16.mxu1 %v5251_v63 }
 0x354   :  { %4451 = vmatpush3.bf16.msra.mxu0 %v5252_v0  ;;  %4473 = vmatpush3.bf16.msra.mxu1 %v5253_v1 }
 0x355   :  { %4452 = vmatprep.subr.bf16.mxu0 %v5254_v2  ;;  %4474 = vmatprep.subr.bf16.mxu1 %v5255_v3 }
 0x358   :  { %4453 = vmatpush3.bf16.msra.mxu0 %v5256_v4  ;;  %4475 = vmatpush3.bf16.msra.mxu1 %v5257_v5 }
 0x359   :  { %4454 = vmatprep.subr.bf16.mxu0 %v5258_v6  ;;  %4476 = vmatprep.subr.bf16.mxu1 %v5259_v8 }
 0x35c   :  { %4455 = vmatpush3.bf16.msra.mxu0 %v5260_v9  ;;  %4477 = vmatpush3.bf16.msra.mxu1 %v5261_v10 }
 0x35d   :  { %4456 = vmatprep.subr.bf16.mxu0 %v5262_v12  ;;  %4478 = vmatprep.subr.bf16.mxu1 %v5263_v14 }
 0x360   :  { %4457 = vmatpush3.bf16.msra.mxu0 %v5264_v15  ;;  %4479 = vmatpush3.bf16.msra.mxu1 %v5265_v16 }
 0x361   :  { %4458 = vmatprep.subr.bf16.mxu0 %v5266_v17  ;;  %4480 = vmatprep.subr.bf16.mxu1 %v5267_v11 }
 0x364   :  { %4459 = vmatpush3.bf16.msra.mxu0 %v5268_v23  ;;  %4481 = vmatpush3.bf16.msra.mxu1 %v5269_v24 }
 0x365   :  { %4460 = vmatprep.subr.bf16.mxu0 %v5270_v25  ;;  %4482 = vmatprep.subr.bf16.mxu1 %v5271_v26 }
 0x368   :  { %4461 = vmatpush3.bf16.msra.mxu0 %v5272_v28  ;;  %4483 = vmatpush3.bf16.msra.mxu1 %v5273_v29 }
 0x41e   :  { %v3494_v36 = vpop.f32.mrb[8].mxu0  ;;  %v3576_v37 = vpop.f32.mrb[8].mxu1 }
 0x41f   :  { %v4498_v7 = vadd.f32 %v3494_v36, %v2762_v32  ;;  %v4500_v38 = vadd.f32 %v3576_v37, %v2770_v33  ;;  %v3496_v39 = vpop.f32.mrb[9].mxu0  ;;  %v3578_v18 = vpop.f32.mrb[9].mxu1 }
 0x420   :  { %v4499_v40 = vadd.f32 %v3496_v39, %v2766_v34  ;;  %v4501_v13 = vadd.f32 %v3578_v18, %v2774_v35  ;;  %v3498_v41 = vpop.f32.mrb[10].mxu0  ;;  %v3580_v42 = vpop.f32.mrb[10].mxu1 }
 0x421   :  { %v3583_v43 = vmax.f32 %v4498_v7, 0.0  ;;  %v3585_v44 = vmax.f32 %v4500_v38, 0.0  ;;  %v3499_v45 = vpop.f32.mrb[11].mxu0  ;;  %v3581_v19 = vpop.f32.mrb[11].mxu1 }
 0x422   :  { %v3584_v20 = vmax.f32 %v4499_v40, 0.0  ;;  %v3586_v31 = vmax.f32 %v4501_v13, 0.0 }
 0x423   :  { %v3587_v47 = vpack.c.bf16 %v3583_v43, %v3583_v43  ;;  %v3589_v22 = vpack.c.bf16 %v3585_v44, %v3585_v44 }
 0x424   :  { %v3588_v46 = vpack.c.bf16 %v3584_v20, %v3584_v20  ;;  %v3590_v21 = vpack.c.bf16 %v3586_v31, %v3586_v31 }
 0x426   :  { %3884 = vmatprep.mubr.bf16.mxu0 %v3588_v46  ;;  %3924 = vmatprep.mubr.bf16.mxu1 %v3590_v21 }
 0x427   :  { %3885 = vmatmul.mubr.bf16.vlgmr.msra.gmra.mrb[12].mxu0 %v3587_v47  ;;  %3925 = vmatmul.mubr.bf16.vlgmr.msra.gmra.mrb[12].mxu1 %v3589_v22 }
 0x4fa   :  { %v4462_v48 = vpop.f32.mrb[12].mxu0  ;;  %v4484_v49 = vpop.f32.mrb[12].mxu1 }
 0x4fb   :  { %v4463_v50 = vpop.f32.mrb[13].mxu0  ;;  %v4485_v51 = vpop.f32.mrb[13].mxu1 }
 0x4fc   :  { %v4464_v52 = vadd.f32 %v4463_v50, %v4462_v48  ;;  %v4486_v53 = vadd.f32 %v4485_v51, %v4484_v49  ;;  %v4465_v54 = vpop.f32.mrb[14].mxu0  ;;  %v4487_v55 = vpop.f32.mrb[14].mxu1 }
 0x4fd   :  { %v4466_v56 = vpop.f32.mrb[15].mxu0  ;;  %v4488_v57 = vpop.f32.mrb[15].mxu1 }
 0x4fe   :  { %v3887_v58 = vadd.f32 %v4464_v52, %v4413_v27 }
 0x500   :  { %v3927_v59 = vadd.f32 %v4486_v53, %v3887_v58 }
 0x502   :  { %3933 = vst.msk [vmem:[#allocation8] sm:$0xff] %vm3932_vm1, %v3927_v59 }
 0x503   :  { %5351 = shalt.err (!%p5348_p0)
}
 0x504   :  { %s5352_s24 = scalar_lea.hbm %s5656_s6, 128 }
 0x505   :  { %p5353_p1 = scmp.ne.s32.totalorder %s5656_s6, %s5352_s24  ;;  %p5356_p2 = scmp.lt.u32.totalorder %s5352_s24, %s5656_s6 }
 0x507   :  { %p5358_p3 = pnand %p5356_p2, %p5353_p1 }
 0x509   :  { %5361 = shalt.err (!%p5358_p3)
}
 0x50a   :  { %3943 = dma.vmem_to_hbm [thread:$0]  %s3941_s7, 128, %s5656_s6, [#allocation4]  }
 0x50b   :  { %5366 = dma.done.wait [#allocation4], 128  }
 0x50c   :  { %5367 = vsyncadd [#allocation4], 4294967168 }
 0x50d   :  { %3947 = vsyncpa [#allocation3], 1 }
 0x50e   :  { %3948 = vsyncpa [#allocation6], 1 }
 0x50f   :  { %3949 = vsyncpa [#allocation4], 1 }

</bundles_post_ra>
